<compile_context>
chip_gen: v7x
topology: tpu7x:2x2x1
jax: 0.10.0
libtpu: 0.0.40
codegen_flags: <defaults>
</compile_context>

<pallas_src>
import math

import jax
import jax.numpy as jnp
from jax.experimental import pallas as pl
from jax.experimental.pallas import tpu as pltpu


# ----------------------------------------------------------------------------
# Single Pallas kernel: full 2-layer bidirectional LSTM (gate-major packed).
# ----------------------------------------------------------------------------
def _bilstm2_kernel(gxm0_ref, whh0_ref, w1a_ref, w1b_ref, b1_ref, whh1_ref,
                    h0c_ref, c0c_ref,
                    out_ref, hn_ref, cn_ref):
    T, B, G8 = gxm0_ref.shape
    G2 = G8 // 4            # 2H: one gate block == width of the fused state
    H = G2 // 2

    def run_layer(gxm, w_hh, h_cat, c_cat):
        """One fused bidirectional layer.

        gxm   : list of T (B, 8H) pre-merged gate inputs; entry s already holds
                fwd gate inputs for time s and rev gate inputs for time T-1-s,
                gate-major packed [i_f i_r | f_f f_r | g_f g_r | o_f o_r].
        w_hh  : (2H, 8H) recurrent weights (rows = [h_fwd | h_rev], block form).
        h_cat : (B, 2H) fused [h_fwd | h_rev]; c_cat likewise.
        Returns (list of T per-step h_cat values, final h_cat, final c_cat).
        """
        hs = [None] * T
        for s in range(T):
            # Single MXU push per step: both directions, all 4 gates (8H lanes).
            rec = jnp.dot(h_cat, w_hh, preferred_element_type=jnp.float32)
            gates = gxm[s] + rec
            sg = jax.nn.sigmoid(gates)                     # i, f, o slices below
            g = jnp.tanh(gates[:, 2 * G2:3 * G2])          # tanh on g-block only
            c_cat = sg[:, G2:2 * G2] * c_cat + sg[:, 0:G2] * g
            h_cat = sg[:, 3 * G2:4 * G2] * jnp.tanh(c_cat)  # one fused tanh(c)
            hs[s] = h_cat
        return hs, h_cat, c_cat

    # ------------------------------ layer 0 ------------------------------
    whh0 = whh0_ref[...]
    gxm0 = [gxm0_ref[s] for s in range(T)]
    hcat0, hf0, cf0 = run_layer(gxm0, whh0, h0c_ref[0], c0c_ref[0])
    hn_ref[0] = hf0                      # fused [h_fwd_final | h_rev_final]
    cn_ref[0] = cf0

    # ---- layer-1 merged gate inputs (independent of layer-1 recurrence) ----
    # hcat0[s]       = [h0_fwd(s)     | h0_rev(T-1-s)]
    # hcat0[T-1-s]   = [h0_fwd(T-1-s) | h0_rev(s)    ]
    # w1a / w1b are packed in the wrapper so that
    #   gxm1[s] = hcat0[s] @ w1a + hcat0[T-1-s] @ w1b + b1
    # equals the gate-major merged layer-1 input projection for step s.
    w1a = w1a_ref[...]
    w1b = w1b_ref[...]
    b1 = b1_ref[...]
    gxm1 = [jnp.dot(hcat0[s], w1a, preferred_element_type=jnp.float32)
            + jnp.dot(hcat0[T - 1 - s], w1b, preferred_element_type=jnp.float32)
            + b1
            for s in range(T)]

    # ------------------------------ layer 1 ------------------------------
    whh1 = whh1_ref[...]
    hcat1, hf1, cf1 = run_layer(gxm1, whh1, h0c_ref[1], c0c_ref[1])
    hn_ref[1] = hf1
    cn_ref[1] = cf1

    # ---- lane-dense epilogue: out[:, t*2H:(t+1)*2H] = [h1_fwd(t) | h1_rev(t)]
    lane = jax.lax.broadcasted_iota(jnp.int32, (B, G2), 1)
    mask_f = lane < H                    # fwd half of the fused state
    outs = [jnp.where(mask_f, hcat1[t], hcat1[T - 1 - t]) for t in range(T)]
    out_ref[...] = jnp.concatenate(outs, axis=1)          # (B, T*2H), unmasked vst


def _bilstm2_call(gxm0, whh0, w1a, w1b, b1, whh1, h0c, c0c, *, B, T, H):
    vmem = pl.BlockSpec(memory_space=pltpu.MemorySpace.VMEM)
    return pl.pallas_call(
        _bilstm2_kernel,
        out_shape=(
            jax.ShapeDtypeStruct((B, T * 2 * H), jnp.float32),   # lane-dense output
            jax.ShapeDtypeStruct((2, B, 2 * H), jnp.float32),    # fused h_n per layer
            jax.ShapeDtypeStruct((2, B, 2 * H), jnp.float32),    # fused c_n per layer
        ),
        in_specs=[vmem] * 8,
        out_specs=(vmem, vmem, vmem),
    )(gxm0, whh0, w1a, w1b, b1, whh1, h0c, c0c)


# ----------------------------------------------------------------------------
# Parameter packing: PyTorch-style raw weights -> gate-major interleaved layout.
# ----------------------------------------------------------------------------
def _interleave_gates(cols_f, cols_r, H):
    """Columns (.., 4H) per direction (gate order i,f,g,o) ->
    gate-major direction-interleaved columns (.., 8H)."""
    blocks = []
    for k in range(4):
        blocks.append(cols_f[..., k * H:(k + 1) * H])
        blocks.append(cols_r[..., k * H:(k + 1) * H])
    return jnp.concatenate(blocks, axis=-1)


def _pack_params(raw, H):
    (l0f, l0r), (l1f, l1r) = raw

    def tt(w):                 # PyTorch (4H, in) -> (in, 4H); gate order kept
        return jnp.transpose(w)

    def bias(p):
        return (p["b_ih"] + p["b_hh"])[None, :]            # (1, 4H)

    zH = jnp.zeros((H, 4 * H), jnp.float32)

    def pack_whh(pf, pr):
        top = _interleave_gates(tt(pf["w_hh"]), zH, H)     # rows for h_fwd
        bot = _interleave_gates(zH, tt(pr["w_hh"]), H)     # rows for h_rev
        return jnp.concatenate([top, bot], axis=0)         # (2H, 8H)

    w_ih1_f = tt(l1f["w_ih"])   # (2H, 4H): rows [0:H]=h0_fwd dims, [H:2H]=h0_rev
    w_ih1_r = tt(l1r["w_ih"])
    # w1a multiplies hcat0[s]     = [h0_fwd(s)     | h0_rev(T-1-s)]
    # w1b multiplies hcat0[T-1-s] = [h0_fwd(T-1-s) | h0_rev(s)    ]
    w1_a = jnp.concatenate(
        [_interleave_gates(w_ih1_f[:H], zH, H),     # h0_fwd(s)     -> fwd lanes
         _interleave_gates(zH, w_ih1_r[H:], H)],    # h0_rev(T-1-s) -> rev lanes
        axis=0)
    w1_b = jnp.concatenate(
        [_interleave_gates(zH, w_ih1_r[:H], H),     # h0_fwd(T-1-s) -> rev lanes
         _interleave_gates(w_ih1_f[H:], zH, H)],    # h0_rev(s)     -> fwd lanes
        axis=0)

    return {
        "hidden_per_dir": H,
        "w_ih0": _interleave_gates(tt(l0f["w_ih"]), tt(l0r["w_ih"]), H),  # (IN, 8H)
        "b0": _interleave_gates(bias(l0f), bias(l0r), H),                 # (1, 8H)
        "whh0": pack_whh(l0f, l0r),                                       # (2H, 8H)
        "w1_a": w1_a,                                                     # (2H, 8H)
        "w1_b": w1_b,                                                     # (2H, 8H)
        "b1": _interleave_gates(bias(l1f), bias(l1r), H),                 # (1, 8H)
        "whh1": pack_whh(l1f, l1r),                                       # (2H, 8H)
        "fwd_mask8": (jnp.arange(8 * H) % (2 * H)) < H,                   # (8H,)
    }


def init_params(key, input_size, hidden_size, bidirectional=True):
    """nn.LSTM(input_size, hidden_size//2, num_layers=2, bidirectional=True)."""
    assert bidirectional and hidden_size % 2 == 0
    H = hidden_size // 2
    bound = 1.0 / math.sqrt(H)
    raw = []
    for layer in range(2):
        in_l = input_size if layer == 0 else 2 * H
        dirs = []
        for _ in range(2):
            key, k1, k2, k3, k4 = jax.random.split(key, 5)
            dirs.append({
                "w_ih": jax.random.uniform(k1, (4 * H, in_l), jnp.float32, -bound, bound),
                "w_hh": jax.random.uniform(k2, (4 * H, H), jnp.float32, -bound, bound),
                "b_ih": jax.random.uniform(k3, (4 * H,), jnp.float32, -bound, bound),
                "b_hh": jax.random.uniform(k4, (4 * H,), jnp.float32, -bound, bound),
            })
        raw.append(dirs)
    params = _pack_params(raw, H)
    params["raw"] = raw
    return params


# ----------------------------------------------------------------------------
# Forward pass equivalent to His_Temporal_Module.forward (eval mode)
# ----------------------------------------------------------------------------
def his_temporal_forward(x, params, hidden=None):
    B, T, _ = x.shape
    H = params["hidden_per_dir"]
    G2 = 2 * H
    if hidden is None:
        h0 = jnp.zeros((4, B, H), jnp.float32)
        c0 = jnp.zeros((4, B, H), jnp.float32)
    else:
        h0, c0 = hidden
        h0 = h0.astype(jnp.float32)
        c0 = c0.astype(jnp.float32)

    # Fused per-layer initial states (2, B, 2H): [fwd | rev] per layer.
    h0c = jnp.concatenate([h0[0::2], h0[1::2]], axis=-1)
    c0c = jnp.concatenate([c0[0::2], c0[1::2]], axis=-1)

    # Hoisted layer-0 input projection (both directions, all gates, bias folded),
    # then pre-merge fwd/rev halves so per-step gate inputs are ready-made.
    x_tm = jnp.swapaxes(x.astype(jnp.float32), 0, 1)                     # (T, B, IN)
    gx0 = jnp.dot(x_tm, params["w_ih0"],
                  precision=jax.lax.Precision.HIGHEST) + params["b0"]    # (T, B, 8H)
    gxm0 = jnp.where(params["fwd_mask8"], gx0, gx0[::-1])                # (T, B, 8H)

    out_wide, hn_cat, cn_cat = _bilstm2_call(
        gxm0, params["whh0"], params["w1_a"], params["w1_b"], params["b1"],
        params["whh1"], h0c, c0c, B=B, T=T, H=H)

    last_hiddens = out_wide.reshape(B, T, G2)                            # free view
    h_n = hn_cat.reshape(2, B, 2, H).transpose(0, 2, 1, 3).reshape(4, B, H)
    c_n = cn_cat.reshape(2, B, 2, H).transpose(0, 2, 1, 3).reshape(4, B, H)
    # self.dropout(last_hiddens): identity at inference time.
    return last_hiddens, (h_n, c_n)


# ----------------------------------------------------------------------------
# Pure-JAX reference built directly from the raw PyTorch-layout weights.
# ----------------------------------------------------------------------------
def _ref_lstm_direction(x_tm, w_ih, w_hh, b_ih, b_hh, h0, c0, reverse):
    T = x_tm.shape[0]
    H = h0.shape[-1]
    order = range(T - 1, -1, -1) if reverse else range(T)
    h, c = h0, c0
    outs = [None] * T
    hi = jax.lax.Precision.HIGHEST
    for t in order:
        g = (jnp.dot(x_tm[t], w_ih.T, precision=hi)
             + jnp.dot(h, w_hh.T, precision=hi) + b_ih + b_hh)
        i = jax.nn.sigmoid(g[:, 0:H])
        f = jax.nn.sigmoid(g[:, H:2 * H])
        gg = jnp.tanh(g[:, 2 * H:3 * H])
        o = jax.nn.sigmoid(g[:, 3 * H:4 * H])
        c = f * c + i * gg
        h = o * jnp.tanh(c)
        outs[t] = h
    return jnp.stack(outs, axis=0), h, c


def _ref_forward(x, params, hidden=None):
    raw = params["raw"]
    H = params["hidden_per_dir"]
    B, T, _ = x.shape
    if hidden is None:
        h0 = jnp.zeros((4, B, H), jnp.float32)
        c0 = jnp.zeros((4, B, H), jnp.float32)
    else:
        h0, c0 = hidden
    layer_in = jnp.transpose(x.astype(jnp.float32), (1, 0, 2))
    hs, cs = [], []
    for l in range(2):
        outs = []
        for d in range(2):
            p = raw[l][d]
            idx = 2 * l + d
            o, hf, cf = _ref_lstm_direction(layer_in, p["w_ih"], p["w_hh"],
                                            p["b_ih"], p["b_hh"],
                                            h0[idx], c0[idx], reverse=(d == 1))
            outs.append(o)
            hs.append(hf)
            cs.append(cf)
        layer_in = jnp.concatenate(outs, axis=-1)
    return (jnp.transpose(layer_in, (1, 0, 2)),
            (jnp.stack(hs, axis=0), jnp.stack(cs, axis=0)))


if __name__ == "__main__":
    key = jax.random.PRNGKey(0)
    B, T = 2, 8
    input_size, hidden_size = 16, 32       # bidirectional -> per-direction hidden = 16

    pkey, xkey, hkey, ckey = jax.random.split(key, 4)
    params = init_params(pkey, input_size, hidden_size)
    x = jax.random.normal(xkey, (B, T, input_size), jnp.float32)

    # Default path (hidden=None -> zero initial states, as in PyTorch).
    out, (h_n, c_n) = his_temporal_forward(x, params, hidden=None)
    jax.block_until_ready((out, h_n, c_n))

    ref_out, (ref_h, ref_c) = _ref_forward(x, params, hidden=None)
    assert out.shape == (B, T, hidden_size)
    assert h_n.shape == (4, B, hidden_size // 2)
    assert c_n.shape == (4, B, hidden_size // 2)
    assert jnp.allclose(out, ref_out, atol=1e-3, rtol=1e-3)
    assert jnp.allclose(h_n, ref_h, atol=1e-3, rtol=1e-3)
    assert jnp.allclose(c_n, ref_c, atol=1e-3, rtol=1e-3)

    # Explicit initial-hidden path.
    Hd = hidden_size // 2
    h0 = 0.1 * jax.random.normal(hkey, (4, B, Hd), jnp.float32)
    c0 = 0.1 * jax.random.normal(ckey, (4, B, Hd), jnp.float32)
    out2, (h2, c2) = his_temporal_forward(x, params, hidden=(h0, c0))
    jax.block_until_ready((out2, h2, c2))
    ref_out2, (ref_h2, ref_c2) = _ref_forward(x, params, hidden=(h0, c0))
    assert jnp.allclose(out2, ref_out2, atol=1e-3, rtol=1e-3)
    assert jnp.allclose(h2, ref_h2, atol=1e-3, rtol=1e-3)
    assert jnp.allclose(c2, ref_c2, atol=1e-3, rtol=1e-3)

    print("KERNEL_OK")
</pallas_src>

<mosaic_0001>
module attributes {stable_mosaic.version = 11 : i64} {
  func.func @_bilstm2_kernel(%arg0: memref<8x2x128xf32, #tpu.memory_space<vmem>>, %arg1: memref<32x128xf32, #tpu.memory_space<vmem>>, %arg2: memref<32x128xf32, #tpu.memory_space<vmem>>, %arg3: memref<32x128xf32, #tpu.memory_space<vmem>>, %arg4: memref<1x128xf32, #tpu.memory_space<vmem>>, %arg5: memref<32x128xf32, #tpu.memory_space<vmem>>, %arg6: memref<2x2x32xf32, #tpu.memory_space<vmem>>, %arg7: memref<2x2x32xf32, #tpu.memory_space<vmem>>, %arg8: memref<2x256xf32, #tpu.memory_space<vmem>>, %arg9: memref<2x2x32xf32, #tpu.memory_space<vmem>>, %arg10: memref<2x2x32xf32, #tpu.memory_space<vmem>>) attributes {dimension_semantics = [], scalar_prefetch = 0 : i64, scratch_operands = 0 : i64, tpu.core_type = #tpu.core_type<tc>} {
    %c0 = arith.constant 0 : index
    %c0_0 = arith.constant 0 : index
    %0 = vector.load %arg1[%c0, %c0_0] : memref<32x128xf32, #tpu.memory_space<vmem>>, vector<32x128xf32>
    %c0_1 = arith.constant 0 : index
    %c0_2 = arith.constant 0 : index
    %c0_3 = arith.constant 0 : index
    %1 = vector.load %arg0[%c0_1, %c0_2, %c0_3] : memref<8x2x128xf32, #tpu.memory_space<vmem>>, vector<1x2x128xf32>
    %2 = vector.shape_cast %1 : vector<1x2x128xf32> to vector<2x128xf32>
    %c1 = arith.constant 1 : index
    %c0_4 = arith.constant 0 : index
    %c0_5 = arith.constant 0 : index
    %3 = vector.load %arg0[%c1, %c0_4, %c0_5] : memref<8x2x128xf32, #tpu.memory_space<vmem>>, vector<1x2x128xf32>
    %4 = vector.shape_cast %3 : vector<1x2x128xf32> to vector<2x128xf32>
    %c2 = arith.constant 2 : index
    %c0_6 = arith.constant 0 : index
    %c0_7 = arith.constant 0 : index
    %5 = vector.load %arg0[%c2, %c0_6, %c0_7] : memref<8x2x128xf32, #tpu.memory_space<vmem>>, vector<1x2x128xf32>
    %6 = vector.shape_cast %5 : vector<1x2x128xf32> to vector<2x128xf32>
    %c3 = arith.constant 3 : index
    %c0_8 = arith.constant 0 : index
    %c0_9 = arith.constant 0 : index
    %7 = vector.load %arg0[%c3, %c0_8, %c0_9] : memref<8x2x128xf32, #tpu.memory_space<vmem>>, vector<1x2x128xf32>
    %8 = vector.shape_cast %7 : vector<1x2x128xf32> to vector<2x128xf32>
    %c4 = arith.constant 4 : index
    %c0_10 = arith.constant 0 : index
    %c0_11 = arith.constant 0 : index
    %9 = vector.load %arg0[%c4, %c0_10, %c0_11] : memref<8x2x128xf32, #tpu.memory_space<vmem>>, vector<1x2x128xf32>
    %10 = vector.shape_cast %9 : vector<1x2x128xf32> to vector<2x128xf32>
    %c5 = arith.constant 5 : index
    %c0_12 = arith.constant 0 : index
    %c0_13 = arith.constant 0 : index
    %11 = vector.load %arg0[%c5, %c0_12, %c0_13] : memref<8x2x128xf32, #tpu.memory_space<vmem>>, vector<1x2x128xf32>
    %12 = vector.shape_cast %11 : vector<1x2x128xf32> to vector<2x128xf32>
    %c6 = arith.constant 6 : index
    %c0_14 = arith.constant 0 : index
    %c0_15 = arith.constant 0 : index
    %13 = vector.load %arg0[%c6, %c0_14, %c0_15] : memref<8x2x128xf32, #tpu.memory_space<vmem>>, vector<1x2x128xf32>
    %14 = vector.shape_cast %13 : vector<1x2x128xf32> to vector<2x128xf32>
    %c7 = arith.constant 7 : index
    %c0_16 = arith.constant 0 : index
    %c0_17 = arith.constant 0 : index
    %15 = vector.load %arg0[%c7, %c0_16, %c0_17] : memref<8x2x128xf32, #tpu.memory_space<vmem>>, vector<1x2x128xf32>
    %16 = vector.shape_cast %15 : vector<1x2x128xf32> to vector<2x128xf32>
    %c0_18 = arith.constant 0 : index
    %c0_19 = arith.constant 0 : index
    %c0_20 = arith.constant 0 : index
    %17 = vector.load %arg6[%c0_18, %c0_19, %c0_20] : memref<2x2x32xf32, #tpu.memory_space<vmem>>, vector<1x2x32xf32>
    %18 = vector.shape_cast %17 : vector<1x2x32xf32> to vector<2x32xf32>
    %c0_21 = arith.constant 0 : index
    %c0_22 = arith.constant 0 : index
    %c0_23 = arith.constant 0 : index
    %19 = vector.load %arg7[%c0_21, %c0_22, %c0_23] : memref<2x2x32xf32, #tpu.memory_space<vmem>>, vector<1x2x32xf32>
    %20 = vector.shape_cast %19 : vector<1x2x32xf32> to vector<2x32xf32>
    %cst = arith.constant dense<0.000000e+00> : vector<2x128xf32>
    %21 = tpu.matmul %18, %0, %cst {dimension_numbers = #tpu.dot_dimension_numbers<[1], [0], [0], [1], [0, 0, 1, 1], [], []>} : vector<2x32xf32>, vector<32x128xf32>, vector<2x128xf32> -> vector<2x128xf32>
    %22 = arith.addf %2, %21 : vector<2x128xf32>
    %23 = arith.negf %22 : vector<2x128xf32>
    %24 = math.exp %23 : vector<2x128xf32>
    %cst_24 = arith.constant 1.000000e+00 : f32
    %25 = vector.broadcast %cst_24 : f32 to vector<2x128xf32>
    %26 = arith.addf %25, %24 : vector<2x128xf32>
    %27 = arith.divf %25, %26 : vector<2x128xf32>
    %28 = vector.extract_strided_slice %22 {offsets = [0, 64], sizes = [2, 32], strides = [1, 1]} : vector<2x128xf32> to vector<2x32xf32>
    %29 = math.tanh %28 : vector<2x32xf32>
    %30 = vector.extract_strided_slice %27 {offsets = [0, 32], sizes = [2, 32], strides = [1, 1]} : vector<2x128xf32> to vector<2x32xf32>
    %31 = arith.mulf %30, %20 : vector<2x32xf32>
    %32 = vector.extract_strided_slice %27 {offsets = [0, 0], sizes = [2, 32], strides = [1, 1]} : vector<2x128xf32> to vector<2x32xf32>
    %33 = arith.mulf %32, %29 : vector<2x32xf32>
    %34 = arith.addf %31, %33 : vector<2x32xf32>
    %35 = vector.extract_strided_slice %27 {offsets = [0, 96], sizes = [2, 32], strides = [1, 1]} : vector<2x128xf32> to vector<2x32xf32>
    %36 = math.tanh %34 : vector<2x32xf32>
    %37 = arith.mulf %35, %36 : vector<2x32xf32>
    %cst_25 = arith.constant dense<0.000000e+00> : vector<2x128xf32>
    %38 = tpu.matmul %37, %0, %cst_25 {dimension_numbers = #tpu.dot_dimension_numbers<[1], [0], [0], [1], [0, 0, 1, 1], [], []>} : vector<2x32xf32>, vector<32x128xf32>, vector<2x128xf32> -> vector<2x128xf32>
    %39 = arith.addf %4, %38 : vector<2x128xf32>
    %40 = arith.negf %39 : vector<2x128xf32>
    %41 = math.exp %40 : vector<2x128xf32>
    %cst_26 = arith.constant 1.000000e+00 : f32
    %42 = vector.broadcast %cst_26 : f32 to vector<2x128xf32>
    %43 = arith.addf %42, %41 : vector<2x128xf32>
    %44 = arith.divf %42, %43 : vector<2x128xf32>
    %45 = vector.extract_strided_slice %39 {offsets = [0, 64], sizes = [2, 32], strides = [1, 1]} : vector<2x128xf32> to vector<2x32xf32>
    %46 = math.tanh %45 : vector<2x32xf32>
    %47 = vector.extract_strided_slice %44 {offsets = [0, 32], sizes = [2, 32], strides = [1, 1]} : vector<2x128xf32> to vector<2x32xf32>
    %48 = arith.mulf %47, %34 : vector<2x32xf32>
    %49 = vector.extract_strided_slice %44 {offsets = [0, 0], sizes = [2, 32], strides = [1, 1]} : vector<2x128xf32> to vector<2x32xf32>
    %50 = arith.mulf %49, %46 : vector<2x32xf32>
    %51 = arith.addf %48, %50 : vector<2x32xf32>
    %52 = vector.extract_strided_slice %44 {offsets = [0, 96], sizes = [2, 32], strides = [1, 1]} : vector<2x128xf32> to vector<2x32xf32>
    %53 = math.tanh %51 : vector<2x32xf32>
    %54 = arith.mulf %52, %53 : vector<2x32xf32>
    %cst_27 = arith.constant dense<0.000000e+00> : vector<2x128xf32>
    %55 = tpu.matmul %54, %0, %cst_27 {dimension_numbers = #tpu.dot_dimension_numbers<[1], [0], [0], [1], [0, 0, 1, 1], [], []>} : vector<2x32xf32>, vector<32x128xf32>, vector<2x128xf32> -> vector<2x128xf32>
    %56 = arith.addf %6, %55 : vector<2x128xf32>
    %57 = arith.negf %56 : vector<2x128xf32>
    %58 = math.exp %57 : vector<2x128xf32>
    %cst_28 = arith.constant 1.000000e+00 : f32
    %59 = vector.broadcast %cst_28 : f32 to vector<2x128xf32>
    %60 = arith.addf %59, %58 : vector<2x128xf32>
    %61 = arith.divf %59, %60 : vector<2x128xf32>
    %62 = vector.extract_strided_slice %56 {offsets = [0, 64], sizes = [2, 32], strides = [1, 1]} : vector<2x128xf32> to vector<2x32xf32>
    %63 = math.tanh %62 : vector<2x32xf32>
    %64 = vector.extract_strided_slice %61 {offsets = [0, 32], sizes = [2, 32], strides = [1, 1]} : vector<2x128xf32> to vector<2x32xf32>
    %65 = arith.mulf %64, %51 : vector<2x32xf32>
    %66 = vector.extract_strided_slice %61 {offsets = [0, 0], sizes = [2, 32], strides = [1, 1]} : vector<2x128xf32> to vector<2x32xf32>
    %67 = arith.mulf %66, %63 : vector<2x32xf32>
    %68 = arith.addf %65, %67 : vector<2x32xf32>
    %69 = vector.extract_strided_slice %61 {offsets = [0, 96], sizes = [2, 32], strides = [1, 1]} : vector<2x128xf32> to vector<2x32xf32>
    %70 = math.tanh %68 : vector<2x32xf32>
    %71 = arith.mulf %69, %70 : vector<2x32xf32>
    %cst_29 = arith.constant dense<0.000000e+00> : vector<2x128xf32>
    %72 = tpu.matmul %71, %0, %cst_29 {dimension_numbers = #tpu.dot_dimension_numbers<[1], [0], [0], [1], [0, 0, 1, 1], [], []>} : vector<2x32xf32>, vector<32x128xf32>, vector<2x128xf32> -> vector<2x128xf32>
    %73 = arith.addf %8, %72 : vector<2x128xf32>
    %74 = arith.negf %73 : vector<2x128xf32>
    %75 = math.exp %74 : vector<2x128xf32>
    %cst_30 = arith.constant 1.000000e+00 : f32
    %76 = vector.broadcast %cst_30 : f32 to vector<2x128xf32>
    %77 = arith.addf %76, %75 : vector<2x128xf32>
    %78 = arith.divf %76, %77 : vector<2x128xf32>
    %79 = vector.extract_strided_slice %73 {offsets = [0, 64], sizes = [2, 32], strides = [1, 1]} : vector<2x128xf32> to vector<2x32xf32>
    %80 = math.tanh %79 : vector<2x32xf32>
    %81 = vector.extract_strided_slice %78 {offsets = [0, 32], sizes = [2, 32], strides = [1, 1]} : vector<2x128xf32> to vector<2x32xf32>
    %82 = arith.mulf %81, %68 : vector<2x32xf32>
    %83 = vector.extract_strided_slice %78 {offsets = [0, 0], sizes = [2, 32], strides = [1, 1]} : vector<2x128xf32> to vector<2x32xf32>
    %84 = arith.mulf %83, %80 : vector<2x32xf32>
    %85 = arith.addf %82, %84 : vector<2x32xf32>
    %86 = vector.extract_strided_slice %78 {offsets = [0, 96], sizes = [2, 32], strides = [1, 1]} : vector<2x128xf32> to vector<2x32xf32>
    %87 = math.tanh %85 : vector<2x32xf32>
    %88 = arith.mulf %86, %87 : vector<2x32xf32>
    %cst_31 = arith.constant dense<0.000000e+00> : vector<2x128xf32>
    %89 = tpu.matmul %88, %0, %cst_31 {dimension_numbers = #tpu.dot_dimension_numbers<[1], [0], [0], [1], [0, 0, 1, 1], [], []>} : vector<2x32xf32>, vector<32x128xf32>, vector<2x128xf32> -> vector<2x128xf32>
    %90 = arith.addf %10, %89 : vector<2x128xf32>
    %91 = arith.negf %90 : vector<2x128xf32>
    %92 = math.exp %91 : vector<2x128xf32>
    %cst_32 = arith.constant 1.000000e+00 : f32
    %93 = vector.broadcast %cst_32 : f32 to vector<2x128xf32>
    %94 = arith.addf %93, %92 : vector<2x128xf32>
    %95 = arith.divf %93, %94 : vector<2x128xf32>
    %96 = vector.extract_strided_slice %90 {offsets = [0, 64], sizes = [2, 32], strides = [1, 1]} : vector<2x128xf32> to vector<2x32xf32>
    %97 = math.tanh %96 : vector<2x32xf32>
    %98 = vector.extract_strided_slice %95 {offsets = [0, 32], sizes = [2, 32], strides = [1, 1]} : vector<2x128xf32> to vector<2x32xf32>
    %99 = arith.mulf %98, %85 : vector<2x32xf32>
    %100 = vector.extract_strided_slice %95 {offsets = [0, 0], sizes = [2, 32], strides = [1, 1]} : vector<2x128xf32> to vector<2x32xf32>
    %101 = arith.mulf %100, %97 : vector<2x32xf32>
    %102 = arith.addf %99, %101 : vector<2x32xf32>
    %103 = vector.extract_strided_slice %95 {offsets = [0, 96], sizes = [2, 32], strides = [1, 1]} : vector<2x128xf32> to vector<2x32xf32>
    %104 = math.tanh %102 : vector<2x32xf32>
    %105 = arith.mulf %103, %104 : vector<2x32xf32>
    %cst_33 = arith.constant dense<0.000000e+00> : vector<2x128xf32>
    %106 = tpu.matmul %105, %0, %cst_33 {dimension_numbers = #tpu.dot_dimension_numbers<[1], [0], [0], [1], [0, 0, 1, 1], [], []>} : vector<2x32xf32>, vector<32x128xf32>, vector<2x128xf32> -> vector<2x128xf32>
    %107 = arith.addf %12, %106 : vector<2x128xf32>
    %108 = arith.negf %107 : vector<2x128xf32>
    %109 = math.exp %108 : vector<2x128xf32>
    %cst_34 = arith.constant 1.000000e+00 : f32
    %110 = vector.broadcast %cst_34 : f32 to vector<2x128xf32>
    %111 = arith.addf %110, %109 : vector<2x128xf32>
    %112 = arith.divf %110, %111 : vector<2x128xf32>
    %113 = vector.extract_strided_slice %107 {offsets = [0, 64], sizes = [2, 32], strides = [1, 1]} : vector<2x128xf32> to vector<2x32xf32>
    %114 = math.tanh %113 : vector<2x32xf32>
    %115 = vector.extract_strided_slice %112 {offsets = [0, 32], sizes = [2, 32], strides = [1, 1]} : vector<2x128xf32> to vector<2x32xf32>
    %116 = arith.mulf %115, %102 : vector<2x32xf32>
    %117 = vector.extract_strided_slice %112 {offsets = [0, 0], sizes = [2, 32], strides = [1, 1]} : vector<2x128xf32> to vector<2x32xf32>
    %118 = arith.mulf %117, %114 : vector<2x32xf32>
    %119 = arith.addf %116, %118 : vector<2x32xf32>
    %120 = vector.extract_strided_slice %112 {offsets = [0, 96], sizes = [2, 32], strides = [1, 1]} : vector<2x128xf32> to vector<2x32xf32>
    %121 = math.tanh %119 : vector<2x32xf32>
    %122 = arith.mulf %120, %121 : vector<2x32xf32>
    %cst_35 = arith.constant dense<0.000000e+00> : vector<2x128xf32>
    %123 = tpu.matmul %122, %0, %cst_35 {dimension_numbers = #tpu.dot_dimension_numbers<[1], [0], [0], [1], [0, 0, 1, 1], [], []>} : vector<2x32xf32>, vector<32x128xf32>, vector<2x128xf32> -> vector<2x128xf32>
    %124 = arith.addf %14, %123 : vector<2x128xf32>
    %125 = arith.negf %124 : vector<2x128xf32>
    %126 = math.exp %125 : vector<2x128xf32>
    %cst_36 = arith.constant 1.000000e+00 : f32
    %127 = vector.broadcast %cst_36 : f32 to vector<2x128xf32>
    %128 = arith.addf %127, %126 : vector<2x128xf32>
    %129 = arith.divf %127, %128 : vector<2x128xf32>
    %130 = vector.extract_strided_slice %124 {offsets = [0, 64], sizes = [2, 32], strides = [1, 1]} : vector<2x128xf32> to vector<2x32xf32>
    %131 = math.tanh %130 : vector<2x32xf32>
    %132 = vector.extract_strided_slice %129 {offsets = [0, 32], sizes = [2, 32], strides = [1, 1]} : vector<2x128xf32> to vector<2x32xf32>
    %133 = arith.mulf %132, %119 : vector<2x32xf32>
    %134 = vector.extract_strided_slice %129 {offsets = [0, 0], sizes = [2, 32], strides = [1, 1]} : vector<2x128xf32> to vector<2x32xf32>
    %135 = arith.mulf %134, %131 : vector<2x32xf32>
    %136 = arith.addf %133, %135 : vector<2x32xf32>
    %137 = vector.extract_strided_slice %129 {offsets = [0, 96], sizes = [2, 32], strides = [1, 1]} : vector<2x128xf32> to vector<2x32xf32>
    %138 = math.tanh %136 : vector<2x32xf32>
    %139 = arith.mulf %137, %138 : vector<2x32xf32>
    %cst_37 = arith.constant dense<0.000000e+00> : vector<2x128xf32>
    %140 = tpu.matmul %139, %0, %cst_37 {dimension_numbers = #tpu.dot_dimension_numbers<[1], [0], [0], [1], [0, 0, 1, 1], [], []>} : vector<2x32xf32>, vector<32x128xf32>, vector<2x128xf32> -> vector<2x128xf32>
    %141 = arith.addf %16, %140 : vector<2x128xf32>
    %142 = arith.negf %141 : vector<2x128xf32>
    %143 = math.exp %142 : vector<2x128xf32>
    %cst_38 = arith.constant 1.000000e+00 : f32
    %144 = vector.broadcast %cst_38 : f32 to vector<2x128xf32>
    %145 = arith.addf %144, %143 : vector<2x128xf32>
    %146 = arith.divf %144, %145 : vector<2x128xf32>
    %147 = vector.extract_strided_slice %141 {offsets = [0, 64], sizes = [2, 32], strides = [1, 1]} : vector<2x128xf32> to vector<2x32xf32>
    %148 = math.tanh %147 : vector<2x32xf32>
    %149 = vector.extract_strided_slice %146 {offsets = [0, 32], sizes = [2, 32], strides = [1, 1]} : vector<2x128xf32> to vector<2x32xf32>
    %150 = arith.mulf %149, %136 : vector<2x32xf32>
    %151 = vector.extract_strided_slice %146 {offsets = [0, 0], sizes = [2, 32], strides = [1, 1]} : vector<2x128xf32> to vector<2x32xf32>
    %152 = arith.mulf %151, %148 : vector<2x32xf32>
    %153 = arith.addf %150, %152 : vector<2x32xf32>
    %154 = vector.extract_strided_slice %146 {offsets = [0, 96], sizes = [2, 32], strides = [1, 1]} : vector<2x128xf32> to vector<2x32xf32>
    %155 = math.tanh %153 : vector<2x32xf32>
    %156 = arith.mulf %154, %155 : vector<2x32xf32>
    %c0_39 = arith.constant 0 : index
    %c0_40 = arith.constant 0 : index
    %c0_41 = arith.constant 0 : index
    %157 = vector.load %arg9[%c0_39, %c0_40, %c0_41] : memref<2x2x32xf32, #tpu.memory_space<vmem>>, vector<1x2x32xf32>
    %158 = vector.shape_cast %157 : vector<1x2x32xf32> to vector<2x32xf32>
    %159 = vector.shape_cast %156 : vector<2x32xf32> to vector<1x2x32xf32>
    tpu.vector_store %arg9[%c0_39, %c0_40, %c0_41], %159 {strides = array<i32>} : memref<2x2x32xf32, #tpu.memory_space<vmem>>, vector<1x2x32xf32>,
    %c0_42 = arith.constant 0 : index
    %c0_43 = arith.constant 0 : index
    %c0_44 = arith.constant 0 : index
    %160 = vector.load %arg10[%c0_42, %c0_43, %c0_44] : memref<2x2x32xf32, #tpu.memory_space<vmem>>, vector<1x2x32xf32>
    %161 = vector.shape_cast %160 : vector<1x2x32xf32> to vector<2x32xf32>
    %162 = vector.shape_cast %153 : vector<2x32xf32> to vector<1x2x32xf32>
    tpu.vector_store %arg10[%c0_42, %c0_43, %c0_44], %162 {strides = array<i32>} : memref<2x2x32xf32, #tpu.memory_space<vmem>>, vector<1x2x32xf32>,
    %c0_45 = arith.constant 0 : index
    %c0_46 = arith.constant 0 : index
    %163 = vector.load %arg2[%c0_45, %c0_46] : memref<32x128xf32, #tpu.memory_space<vmem>>, vector<32x128xf32>
    %c0_47 = arith.constant 0 : index
    %c0_48 = arith.constant 0 : index
    %164 = vector.load %arg3[%c0_47, %c0_48] : memref<32x128xf32, #tpu.memory_space<vmem>>, vector<32x128xf32>
    %c0_49 = arith.constant 0 : index
    %c0_50 = arith.constant 0 : index
    %165 = vector.load %arg4[%c0_49, %c0_50] : memref<1x128xf32, #tpu.memory_space<vmem>>, vector<1x128xf32>
    %cst_51 = arith.constant dense<0.000000e+00> : vector<2x128xf32>
    %166 = tpu.matmul %37, %163, %cst_51 {dimension_numbers = #tpu.dot_dimension_numbers<[1], [0], [0], [1], [0, 0, 1, 1], [], []>} : vector<2x32xf32>, vector<32x128xf32>, vector<2x128xf32> -> vector<2x128xf32>
    %cst_52 = arith.constant dense<0.000000e+00> : vector<2x128xf32>
    %167 = tpu.matmul %156, %164, %cst_52 {dimension_numbers = #tpu.dot_dimension_numbers<[1], [0], [0], [1], [0, 0, 1, 1], [], []>} : vector<2x32xf32>, vector<32x128xf32>, vector<2x128xf32> -> vector<2x128xf32>
    %168 = arith.addf %166, %167 : vector<2x128xf32>
    %169 = vector.broadcast %165 : vector<1x128xf32> to vector<2x128xf32>
    %170 = arith.addf %168, %169 : vector<2x128xf32>
    %cst_53 = arith.constant dense<0.000000e+00> : vector<2x128xf32>
    %171 = tpu.matmul %54, %163, %cst_53 {dimension_numbers = #tpu.dot_dimension_numbers<[1], [0], [0], [1], [0, 0, 1, 1], [], []>} : vector<2x32xf32>, vector<32x128xf32>, vector<2x128xf32> -> vector<2x128xf32>
    %cst_54 = arith.constant dense<0.000000e+00> : vector<2x128xf32>
    %172 = tpu.matmul %139, %164, %cst_54 {dimension_numbers = #tpu.dot_dimension_numbers<[1], [0], [0], [1], [0, 0, 1, 1], [], []>} : vector<2x32xf32>, vector<32x128xf32>, vector<2x128xf32> -> vector<2x128xf32>
    %173 = arith.addf %171, %172 : vector<2x128xf32>
    %174 = vector.broadcast %165 : vector<1x128xf32> to vector<2x128xf32>
    %175 = arith.addf %173, %174 : vector<2x128xf32>
    %cst_55 = arith.constant dense<0.000000e+00> : vector<2x128xf32>
    %176 = tpu.matmul %71, %163, %cst_55 {dimension_numbers = #tpu.dot_dimension_numbers<[1], [0], [0], [1], [0, 0, 1, 1], [], []>} : vector<2x32xf32>, vector<32x128xf32>, vector<2x128xf32> -> vector<2x128xf32>
    %cst_56 = arith.constant dense<0.000000e+00> : vector<2x128xf32>
    %177 = tpu.matmul %122, %164, %cst_56 {dimension_numbers = #tpu.dot_dimension_numbers<[1], [0], [0], [1], [0, 0, 1, 1], [], []>} : vector<2x32xf32>, vector<32x128xf32>, vector<2x128xf32> -> vector<2x128xf32>
    %178 = arith.addf %176, %177 : vector<2x128xf32>
    %179 = vector.broadcast %165 : vector<1x128xf32> to vector<2x128xf32>
    %180 = arith.addf %178, %179 : vector<2x128xf32>
    %cst_57 = arith.constant dense<0.000000e+00> : vector<2x128xf32>
    %181 = tpu.matmul %88, %163, %cst_57 {dimension_numbers = #tpu.dot_dimension_numbers<[1], [0], [0], [1], [0, 0, 1, 1], [], []>} : vector<2x32xf32>, vector<32x128xf32>, vector<2x128xf32> -> vector<2x128xf32>
    %cst_58 = arith.constant dense<0.000000e+00> : vector<2x128xf32>
    %182 = tpu.matmul %105, %164, %cst_58 {dimension_numbers = #tpu.dot_dimension_numbers<[1], [0], [0], [1], [0, 0, 1, 1], [], []>} : vector<2x32xf32>, vector<32x128xf32>, vector<2x128xf32> -> vector<2x128xf32>
    %183 = arith.addf %181, %182 : vector<2x128xf32>
    %184 = vector.broadcast %165 : vector<1x128xf32> to vector<2x128xf32>
    %185 = arith.addf %183, %184 : vector<2x128xf32>
    %cst_59 = arith.constant dense<0.000000e+00> : vector<2x128xf32>
    %186 = tpu.matmul %105, %163, %cst_59 {dimension_numbers = #tpu.dot_dimension_numbers<[1], [0], [0], [1], [0, 0, 1, 1], [], []>} : vector<2x32xf32>, vector<32x128xf32>, vector<2x128xf32> -> vector<2x128xf32>
    %cst_60 = arith.constant dense<0.000000e+00> : vector<2x128xf32>
    %187 = tpu.matmul %88, %164, %cst_60 {dimension_numbers = #tpu.dot_dimension_numbers<[1], [0], [0], [1], [0, 0, 1, 1], [], []>} : vector<2x32xf32>, vector<32x128xf32>, vector<2x128xf32> -> vector<2x128xf32>
    %188 = arith.addf %186, %187 : vector<2x128xf32>
    %189 = vector.broadcast %165 : vector<1x128xf32> to vector<2x128xf32>
    %190 = arith.addf %188, %189 : vector<2x128xf32>
    %cst_61 = arith.constant dense<0.000000e+00> : vector<2x128xf32>
    %191 = tpu.matmul %122, %163, %cst_61 {dimension_numbers = #tpu.dot_dimension_numbers<[1], [0], [0], [1], [0, 0, 1, 1], [], []>} : vector<2x32xf32>, vector<32x128xf32>, vector<2x128xf32> -> vector<2x128xf32>
    %cst_62 = arith.constant dense<0.000000e+00> : vector<2x128xf32>
    %192 = tpu.matmul %71, %164, %cst_62 {dimension_numbers = #tpu.dot_dimension_numbers<[1], [0], [0], [1], [0, 0, 1, 1], [], []>} : vector<2x32xf32>, vector<32x128xf32>, vector<2x128xf32> -> vector<2x128xf32>
    %193 = arith.addf %191, %192 : vector<2x128xf32>
    %194 = vector.broadcast %165 : vector<1x128xf32> to vector<2x128xf32>
    %195 = arith.addf %193, %194 : vector<2x128xf32>
    %cst_63 = arith.constant dense<0.000000e+00> : vector<2x128xf32>
    %196 = tpu.matmul %139, %163, %cst_63 {dimension_numbers = #tpu.dot_dimension_numbers<[1], [0], [0], [1], [0, 0, 1, 1], [], []>} : vector<2x32xf32>, vector<32x128xf32>, vector<2x128xf32> -> vector<2x128xf32>
    %cst_64 = arith.constant dense<0.000000e+00> : vector<2x128xf32>
    %197 = tpu.matmul %54, %164, %cst_64 {dimension_numbers = #tpu.dot_dimension_numbers<[1], [0], [0], [1], [0, 0, 1, 1], [], []>} : vector<2x32xf32>, vector<32x128xf32>, vector<2x128xf32> -> vector<2x128xf32>
    %198 = arith.addf %196, %197 : vector<2x128xf32>
    %199 = vector.broadcast %165 : vector<1x128xf32> to vector<2x128xf32>
    %200 = arith.addf %198, %199 : vector<2x128xf32>
    %cst_65 = arith.constant dense<0.000000e+00> : vector<2x128xf32>
    %201 = tpu.matmul %156, %163, %cst_65 {dimension_numbers = #tpu.dot_dimension_numbers<[1], [0], [0], [1], [0, 0, 1, 1], [], []>} : vector<2x32xf32>, vector<32x128xf32>, vector<2x128xf32> -> vector<2x128xf32>
    %cst_66 = arith.constant dense<0.000000e+00> : vector<2x128xf32>
    %202 = tpu.matmul %37, %164, %cst_66 {dimension_numbers = #tpu.dot_dimension_numbers<[1], [0], [0], [1], [0, 0, 1, 1], [], []>} : vector<2x32xf32>, vector<32x128xf32>, vector<2x128xf32> -> vector<2x128xf32>
    %203 = arith.addf %201, %202 : vector<2x128xf32>
    %204 = vector.broadcast %165 : vector<1x128xf32> to vector<2x128xf32>
    %205 = arith.addf %203, %204 : vector<2x128xf32>
    %c0_67 = arith.constant 0 : index
    %c0_68 = arith.constant 0 : index
    %206 = vector.load %arg5[%c0_67, %c0_68] : memref<32x128xf32, #tpu.memory_space<vmem>>, vector<32x128xf32>
    %c1_69 = arith.constant 1 : index
    %c0_70 = arith.constant 0 : index
    %c0_71 = arith.constant 0 : index
    %207 = vector.load %arg6[%c1_69, %c0_70, %c0_71] : memref<2x2x32xf32, #tpu.memory_space<vmem>>, vector<1x2x32xf32>
    %208 = vector.shape_cast %207 : vector<1x2x32xf32> to vector<2x32xf32>
    %c1_72 = arith.constant 1 : index
    %c0_73 = arith.constant 0 : index
    %c0_74 = arith.constant 0 : index
    %209 = vector.load %arg7[%c1_72, %c0_73, %c0_74] : memref<2x2x32xf32, #tpu.memory_space<vmem>>, vector<1x2x32xf32>
    %210 = vector.shape_cast %209 : vector<1x2x32xf32> to vector<2x32xf32>
    %cst_75 = arith.constant dense<0.000000e+00> : vector<2x128xf32>
    %211 = tpu.matmul %208, %206, %cst_75 {dimension_numbers = #tpu.dot_dimension_numbers<[1], [0], [0], [1], [0, 0, 1, 1], [], []>} : vector<2x32xf32>, vector<32x128xf32>, vector<2x128xf32> -> vector<2x128xf32>
    %212 = arith.addf %170, %211 : vector<2x128xf32>
    %213 = arith.negf %212 : vector<2x128xf32>
    %214 = math.exp %213 : vector<2x128xf32>
    %cst_76 = arith.constant 1.000000e+00 : f32
    %215 = vector.broadcast %cst_76 : f32 to vector<2x128xf32>
    %216 = arith.addf %215, %214 : vector<2x128xf32>
    %217 = arith.divf %215, %216 : vector<2x128xf32>
    %218 = vector.extract_strided_slice %212 {offsets = [0, 64], sizes = [2, 32], strides = [1, 1]} : vector<2x128xf32> to vector<2x32xf32>
    %219 = math.tanh %218 : vector<2x32xf32>
    %220 = vector.extract_strided_slice %217 {offsets = [0, 32], sizes = [2, 32], strides = [1, 1]} : vector<2x128xf32> to vector<2x32xf32>
    %221 = arith.mulf %220, %210 : vector<2x32xf32>
    %222 = vector.extract_strided_slice %217 {offsets = [0, 0], sizes = [2, 32], strides = [1, 1]} : vector<2x128xf32> to vector<2x32xf32>
    %223 = arith.mulf %222, %219 : vector<2x32xf32>
    %224 = arith.addf %221, %223 : vector<2x32xf32>
    %225 = vector.extract_strided_slice %217 {offsets = [0, 96], sizes = [2, 32], strides = [1, 1]} : vector<2x128xf32> to vector<2x32xf32>
    %226 = math.tanh %224 : vector<2x32xf32>
    %227 = arith.mulf %225, %226 : vector<2x32xf32>
    %cst_77 = arith.constant dense<0.000000e+00> : vector<2x128xf32>
    %228 = tpu.matmul %227, %206, %cst_77 {dimension_numbers = #tpu.dot_dimension_numbers<[1], [0], [0], [1], [0, 0, 1, 1], [], []>} : vector<2x32xf32>, vector<32x128xf32>, vector<2x128xf32> -> vector<2x128xf32>
    %229 = arith.addf %175, %228 : vector<2x128xf32>
    %230 = arith.negf %229 : vector<2x128xf32>
    %231 = math.exp %230 : vector<2x128xf32>
    %cst_78 = arith.constant 1.000000e+00 : f32
    %232 = vector.broadcast %cst_78 : f32 to vector<2x128xf32>
    %233 = arith.addf %232, %231 : vector<2x128xf32>
    %234 = arith.divf %232, %233 : vector<2x128xf32>
    %235 = vector.extract_strided_slice %229 {offsets = [0, 64], sizes = [2, 32], strides = [1, 1]} : vector<2x128xf32> to vector<2x32xf32>
    %236 = math.tanh %235 : vector<2x32xf32>
    %237 = vector.extract_strided_slice %234 {offsets = [0, 32], sizes = [2, 32], strides = [1, 1]} : vector<2x128xf32> to vector<2x32xf32>
    %238 = arith.mulf %237, %224 : vector<2x32xf32>
    %239 = vector.extract_strided_slice %234 {offsets = [0, 0], sizes = [2, 32], strides = [1, 1]} : vector<2x128xf32> to vector<2x32xf32>
    %240 = arith.mulf %239, %236 : vector<2x32xf32>
    %241 = arith.addf %238, %240 : vector<2x32xf32>
    %242 = vector.extract_strided_slice %234 {offsets = [0, 96], sizes = [2, 32], strides = [1, 1]} : vector<2x128xf32> to vector<2x32xf32>
    %243 = math.tanh %241 : vector<2x32xf32>
    %244 = arith.mulf %242, %243 : vector<2x32xf32>
    %cst_79 = arith.constant dense<0.000000e+00> : vector<2x128xf32>
    %245 = tpu.matmul %244, %206, %cst_79 {dimension_numbers = #tpu.dot_dimension_numbers<[1], [0], [0], [1], [0, 0, 1, 1], [], []>} : vector<2x32xf32>, vector<32x128xf32>, vector<2x128xf32> -> vector<2x128xf32>
    %246 = arith.addf %180, %245 : vector<2x128xf32>
    %247 = arith.negf %246 : vector<2x128xf32>
    %248 = math.exp %247 : vector<2x128xf32>
    %cst_80 = arith.constant 1.000000e+00 : f32
    %249 = vector.broadcast %cst_80 : f32 to vector<2x128xf32>
    %250 = arith.addf %249, %248 : vector<2x128xf32>
    %251 = arith.divf %249, %250 : vector<2x128xf32>
    %252 = vector.extract_strided_slice %246 {offsets = [0, 64], sizes = [2, 32], strides = [1, 1]} : vector<2x128xf32> to vector<2x32xf32>
    %253 = math.tanh %252 : vector<2x32xf32>
    %254 = vector.extract_strided_slice %251 {offsets = [0, 32], sizes = [2, 32], strides = [1, 1]} : vector<2x128xf32> to vector<2x32xf32>
    %255 = arith.mulf %254, %241 : vector<2x32xf32>
    %256 = vector.extract_strided_slice %251 {offsets = [0, 0], sizes = [2, 32], strides = [1, 1]} : vector<2x128xf32> to vector<2x32xf32>
    %257 = arith.mulf %256, %253 : vector<2x32xf32>
    %258 = arith.addf %255, %257 : vector<2x32xf32>
    %259 = vector.extract_strided_slice %251 {offsets = [0, 96], sizes = [2, 32], strides = [1, 1]} : vector<2x128xf32> to vector<2x32xf32>
    %260 = math.tanh %258 : vector<2x32xf32>
    %261 = arith.mulf %259, %260 : vector<2x32xf32>
    %cst_81 = arith.constant dense<0.000000e+00> : vector<2x128xf32>
    %262 = tpu.matmul %261, %206, %cst_81 {dimension_numbers = #tpu.dot_dimension_numbers<[1], [0], [0], [1], [0, 0, 1, 1], [], []>} : vector<2x32xf32>, vector<32x128xf32>, vector<2x128xf32> -> vector<2x128xf32>
    %263 = arith.addf %185, %262 : vector<2x128xf32>
    %264 = arith.negf %263 : vector<2x128xf32>
    %265 = math.exp %264 : vector<2x128xf32>
    %cst_82 = arith.constant 1.000000e+00 : f32
    %266 = vector.broadcast %cst_82 : f32 to vector<2x128xf32>
    %267 = arith.addf %266, %265 : vector<2x128xf32>
    %268 = arith.divf %266, %267 : vector<2x128xf32>
    %269 = vector.extract_strided_slice %263 {offsets = [0, 64], sizes = [2, 32], strides = [1, 1]} : vector<2x128xf32> to vector<2x32xf32>
    %270 = math.tanh %269 : vector<2x32xf32>
    %271 = vector.extract_strided_slice %268 {offsets = [0, 32], sizes = [2, 32], strides = [1, 1]} : vector<2x128xf32> to vector<2x32xf32>
    %272 = arith.mulf %271, %258 : vector<2x32xf32>
    %273 = vector.extract_strided_slice %268 {offsets = [0, 0], sizes = [2, 32], strides = [1, 1]} : vector<2x128xf32> to vector<2x32xf32>
    %274 = arith.mulf %273, %270 : vector<2x32xf32>
    %275 = arith.addf %272, %274 : vector<2x32xf32>
    %276 = vector.extract_strided_slice %268 {offsets = [0, 96], sizes = [2, 32], strides = [1, 1]} : vector<2x128xf32> to vector<2x32xf32>
    %277 = math.tanh %275 : vector<2x32xf32>
    %278 = arith.mulf %276, %277 : vector<2x32xf32>
    %cst_83 = arith.constant dense<0.000000e+00> : vector<2x128xf32>
    %279 = tpu.matmul %278, %206, %cst_83 {dimension_numbers = #tpu.dot_dimension_numbers<[1], [0], [0], [1], [0, 0, 1, 1], [], []>} : vector<2x32xf32>, vector<32x128xf32>, vector<2x128xf32> -> vector<2x128xf32>
    %280 = arith.addf %190, %279 : vector<2x128xf32>
    %281 = arith.negf %280 : vector<2x128xf32>
    %282 = math.exp %281 : vector<2x128xf32>
    %cst_84 = arith.constant 1.000000e+00 : f32
    %283 = vector.broadcast %cst_84 : f32 to vector<2x128xf32>
    %284 = arith.addf %283, %282 : vector<2x128xf32>
    %285 = arith.divf %283, %284 : vector<2x128xf32>
    %286 = vector.extract_strided_slice %280 {offsets = [0, 64], sizes = [2, 32], strides = [1, 1]} : vector<2x128xf32> to vector<2x32xf32>
    %287 = math.tanh %286 : vector<2x32xf32>
    %288 = vector.extract_strided_slice %285 {offsets = [0, 32], sizes = [2, 32], strides = [1, 1]} : vector<2x128xf32> to vector<2x32xf32>
    %289 = arith.mulf %288, %275 : vector<2x32xf32>
    %290 = vector.extract_strided_slice %285 {offsets = [0, 0], sizes = [2, 32], strides = [1, 1]} : vector<2x128xf32> to vector<2x32xf32>
    %291 = arith.mulf %290, %287 : vector<2x32xf32>
    %292 = arith.addf %289, %291 : vector<2x32xf32>
    %293 = vector.extract_strided_slice %285 {offsets = [0, 96], sizes = [2, 32], strides = [1, 1]} : vector<2x128xf32> to vector<2x32xf32>
    %294 = math.tanh %292 : vector<2x32xf32>
    %295 = arith.mulf %293, %294 : vector<2x32xf32>
    %cst_85 = arith.constant dense<0.000000e+00> : vector<2x128xf32>
    %296 = tpu.matmul %295, %206, %cst_85 {dimension_numbers = #tpu.dot_dimension_numbers<[1], [0], [0], [1], [0, 0, 1, 1], [], []>} : vector<2x32xf32>, vector<32x128xf32>, vector<2x128xf32> -> vector<2x128xf32>
    %297 = arith.addf %195, %296 : vector<2x128xf32>
    %298 = arith.negf %297 : vector<2x128xf32>
    %299 = math.exp %298 : vector<2x128xf32>
    %cst_86 = arith.constant 1.000000e+00 : f32
    %300 = vector.broadcast %cst_86 : f32 to vector<2x128xf32>
    %301 = arith.addf %300, %299 : vector<2x128xf32>
    %302 = arith.divf %300, %301 : vector<2x128xf32>
    %303 = vector.extract_strided_slice %297 {offsets = [0, 64], sizes = [2, 32], strides = [1, 1]} : vector<2x128xf32> to vector<2x32xf32>
    %304 = math.tanh %303 : vector<2x32xf32>
    %305 = vector.extract_strided_slice %302 {offsets = [0, 32], sizes = [2, 32], strides = [1, 1]} : vector<2x128xf32> to vector<2x32xf32>
    %306 = arith.mulf %305, %292 : vector<2x32xf32>
    %307 = vector.extract_strided_slice %302 {offsets = [0, 0], sizes = [2, 32], strides = [1, 1]} : vector<2x128xf32> to vector<2x32xf32>
    %308 = arith.mulf %307, %304 : vector<2x32xf32>
    %309 = arith.addf %306, %308 : vector<2x32xf32>
    %310 = vector.extract_strided_slice %302 {offsets = [0, 96], sizes = [2, 32], strides = [1, 1]} : vector<2x128xf32> to vector<2x32xf32>
    %311 = math.tanh %309 : vector<2x32xf32>
    %312 = arith.mulf %310, %311 : vector<2x32xf32>
    %cst_87 = arith.constant dense<0.000000e+00> : vector<2x128xf32>
    %313 = tpu.matmul %312, %206, %cst_87 {dimension_numbers = #tpu.dot_dimension_numbers<[1], [0], [0], [1], [0, 0, 1, 1], [], []>} : vector<2x32xf32>, vector<32x128xf32>, vector<2x128xf32> -> vector<2x128xf32>
    %314 = arith.addf %200, %313 : vector<2x128xf32>
    %315 = arith.negf %314 : vector<2x128xf32>
    %316 = math.exp %315 : vector<2x128xf32>
    %cst_88 = arith.constant 1.000000e+00 : f32
    %317 = vector.broadcast %cst_88 : f32 to vector<2x128xf32>
    %318 = arith.addf %317, %316 : vector<2x128xf32>
    %319 = arith.divf %317, %318 : vector<2x128xf32>
    %320 = vector.extract_strided_slice %314 {offsets = [0, 64], sizes = [2, 32], strides = [1, 1]} : vector<2x128xf32> to vector<2x32xf32>
    %321 = math.tanh %320 : vector<2x32xf32>
    %322 = vector.extract_strided_slice %319 {offsets = [0, 32], sizes = [2, 32], strides = [1, 1]} : vector<2x128xf32> to vector<2x32xf32>
    %323 = arith.mulf %322, %309 : vector<2x32xf32>
    %324 = vector.extract_strided_slice %319 {offsets = [0, 0], sizes = [2, 32], strides = [1, 1]} : vector<2x128xf32> to vector<2x32xf32>
    %325 = arith.mulf %324, %321 : vector<2x32xf32>
    %326 = arith.addf %323, %325 : vector<2x32xf32>
    %327 = vector.extract_strided_slice %319 {offsets = [0, 96], sizes = [2, 32], strides = [1, 1]} : vector<2x128xf32> to vector<2x32xf32>
    %328 = math.tanh %326 : vector<2x32xf32>
    %329 = arith.mulf %327, %328 : vector<2x32xf32>
    %cst_89 = arith.constant dense<0.000000e+00> : vector<2x128xf32>
    %330 = tpu.matmul %329, %206, %cst_89 {dimension_numbers = #tpu.dot_dimension_numbers<[1], [0], [0], [1], [0, 0, 1, 1], [], []>} : vector<2x32xf32>, vector<32x128xf32>, vector<2x128xf32> -> vector<2x128xf32>
    %331 = arith.addf %205, %330 : vector<2x128xf32>
    %332 = arith.negf %331 : vector<2x128xf32>
    %333 = math.exp %332 : vector<2x128xf32>
    %cst_90 = arith.constant 1.000000e+00 : f32
    %334 = vector.broadcast %cst_90 : f32 to vector<2x128xf32>
    %335 = arith.addf %334, %333 : vector<2x128xf32>
    %336 = arith.divf %334, %335 : vector<2x128xf32>
    %337 = vector.extract_strided_slice %331 {offsets = [0, 64], sizes = [2, 32], strides = [1, 1]} : vector<2x128xf32> to vector<2x32xf32>
    %338 = math.tanh %337 : vector<2x32xf32>
    %339 = vector.extract_strided_slice %336 {offsets = [0, 32], sizes = [2, 32], strides = [1, 1]} : vector<2x128xf32> to vector<2x32xf32>
    %340 = arith.mulf %339, %326 : vector<2x32xf32>
    %341 = vector.extract_strided_slice %336 {offsets = [0, 0], sizes = [2, 32], strides = [1, 1]} : vector<2x128xf32> to vector<2x32xf32>
    %342 = arith.mulf %341, %338 : vector<2x32xf32>
    %343 = arith.addf %340, %342 : vector<2x32xf32>
    %344 = vector.extract_strided_slice %336 {offsets = [0, 96], sizes = [2, 32], strides = [1, 1]} : vector<2x128xf32> to vector<2x32xf32>
    %345 = math.tanh %343 : vector<2x32xf32>
    %346 = arith.mulf %344, %345 : vector<2x32xf32>
    %c1_91 = arith.constant 1 : index
    %c0_92 = arith.constant 0 : index
    %c0_93 = arith.constant 0 : index
    %347 = vector.load %arg9[%c1_91, %c0_92, %c0_93] : memref<2x2x32xf32, #tpu.memory_space<vmem>>, vector<1x2x32xf32>
    %348 = vector.shape_cast %347 : vector<1x2x32xf32> to vector<2x32xf32>
    %349 = vector.shape_cast %346 : vector<2x32xf32> to vector<1x2x32xf32>
    tpu.vector_store %arg9[%c1_91, %c0_92, %c0_93], %349 {strides = array<i32>} : memref<2x2x32xf32, #tpu.memory_space<vmem>>, vector<1x2x32xf32>,
    %c1_94 = arith.constant 1 : index
    %c0_95 = arith.constant 0 : index
    %c0_96 = arith.constant 0 : index
    %350 = vector.load %arg10[%c1_94, %c0_95, %c0_96] : memref<2x2x32xf32, #tpu.memory_space<vmem>>, vector<1x2x32xf32>
    %351 = vector.shape_cast %350 : vector<1x2x32xf32> to vector<2x32xf32>
    %352 = vector.shape_cast %343 : vector<2x32xf32> to vector<1x2x32xf32>
    tpu.vector_store %arg10[%c1_94, %c0_95, %c0_96], %352 {strides = array<i32>} : memref<2x2x32xf32, #tpu.memory_space<vmem>>, vector<1x2x32xf32>,
    %353 = tpu.iota {dimensions = array<i32: 1>} : vector<2x32xi32>
    %c16_i32 = arith.constant 16 : i32
    %354 = vector.broadcast %c16_i32 : i32 to vector<2x32xi32>
    %355 = arith.cmpi slt, %353, %354 : vector<2x32xi32>
    %356 = arith.select %355, %227, %346 : vector<2x32xi1>, vector<2x32xf32>
    %357 = arith.select %355, %244, %329 : vector<2x32xi1>, vector<2x32xf32>
    %358 = arith.select %355, %261, %312 : vector<2x32xi1>, vector<2x32xf32>
    %359 = arith.select %355, %278, %295 : vector<2x32xi1>, vector<2x32xf32>
    %360 = arith.select %355, %295, %278 : vector<2x32xi1>, vector<2x32xf32>
    %361 = arith.select %355, %312, %261 : vector<2x32xi1>, vector<2x32xf32>
    %362 = arith.select %355, %329, %244 : vector<2x32xi1>, vector<2x32xf32>
    %363 = arith.select %355, %346, %227 : vector<2x32xi1>, vector<2x32xf32>
    %364 = tpu.concatenate %356, %357, %358, %359, %360, %361, %362, %363 in 1 : vector<2x32xf32>, vector<2x32xf32>, vector<2x32xf32>, vector<2x32xf32>, vector<2x32xf32>, vector<2x32xf32>, vector<2x32xf32>, vector<2x32xf32> -> vector<2x256xf32>
    %c0_97 = arith.constant 0 : index
    %c0_98 = arith.constant 0 : index
    %365 = vector.load %arg8[%c0_97, %c0_98] : memref<2x256xf32, #tpu.memory_space<vmem>>, vector<2x256xf32>
    tpu.vector_store %arg8[%c0_97, %c0_98], %364 {strides = array<i32>} : memref<2x256xf32, #tpu.memory_space<vmem>>, vector<2x256xf32>,
    return
  }
}

</mosaic_0001>

<bundles_post_ra>
// kernel: tpu_custom_call.1
= control target key start
LH: loop header
LB: loop body
LE: loop exit
PB: predicated region body
PF: predicated region fallthrough
CT: control target
= control target key end

     0   :  { %16 = vsyncpa [#allocation3], 0  ;;  %s4763_s0 = inlined_call_operand.hbm [shape: f32[8,2,128], index: 0, kind: input, shape index: {}]   ;;  %s4764_s1 = inlined_call_operand.hbm [shape: f32[32,128], index: 1, kind: input, shape index: {}]   ;;  %s4765_s2 = inlined_call_operand.hbm [shape: f32[32,128], index: 2, kind: input, shape index: {}]   ;;  %s4766_s3 = inlined_call_operand.hbm [shape: f32[32,128], index: 3, kind: input, shape index: {}]   ;;  %s4767_s4 = inlined_call_operand.vmem [shape: f32[1,128], index: 4, kind: input, shape index: {}]   ;;  %s4768_s5 = inlined_call_operand.hbm [shape: f32[32,128], index: 5, kind: input, shape index: {}]   ;;  %s4769_s6 = inlined_call_operand.vmem [shape: f32[2,2,32], index: 6, kind: input, shape index: {}]   ;;  %s4770_s7 = inlined_call_operand.vmem [shape: f32[2,2,32], index: 7, kind: input, shape index: {}]   ;;  %s4771_s8 = inlined_call_operand.hbm [shape: f32[2,256], index: 8, kind: output, shape index: {0}]   ;;  %s4772_s9 = inlined_call_operand.hbm [shape: f32[2,2,32], index: 9, kind: output, shape index: {1}]   ;;  %s4773_s10 = inlined_call_operand.hbm [shape: f32[2,2,32], index: 10, kind: output, shape index: {2}]  }
   0x1   :  { %17 = vsyncpa [#allocation6], 0 }
   0x2   :  { %18 = vsyncpa [#allocation9], 0 }
   0x3   :  { %19 = vsyncpa [#allocation4], 0 }
   0x4   :  { %20 = vsyncpa [#allocation13], 0  ;;  %s4141_s13 = smov [#allocation5]   ;;  %s3955_s17 = scalar_lea.hbm %s4764_s1, 512 }
   0x5   :  { %s38_s14 = sshll.u32 %s4141_s13, 4  ;;  %p3956_p0 = scmp.ne.s32.totalorder %s4764_s1, %s3955_s17  ;;  %s39_s14 = int_to_ptr.vmem [resolvable:$true] %s38_s14 }
   0x6   :  { %p3959_p1 = scmp.lt.u32.totalorder %s3955_s17, %s4764_s1 }
   0x8   :  { %p3961_p2 = pnand %p3959_p1, %p3956_p0 }
   0xa   :  { %3964 = shalt.err (!%p3961_p2)
}
   0xb   :  { %s3965_s22 = scalar_lea.vmem %s39_s14, 512  ;;  %p3970_p4 = scmp.lt.s32.totalorder %s39_s14, %s39_s14 }
   0xc   :  { %p3966_p3 = scmp.ne.s32.totalorder %s39_s14, %s3965_s22  ;;  %p3971_p5 = scmp.lt.s32.totalorder %s3965_s22, %s3965_s22 }
   0xe   :  { %p3972_p6 = por %p3971_p5, %p3970_p4 }
  0x10   :  { %p3973_p7 = pnand %p3972_p6, %p3966_p3 }
  0x12   :  { %3976 = shalt.err (!%p3973_p7)
}
  0x13   :  { %s4142_s23 = smov 128   ;;  %s4143_s24 = smov 8  }
  0x14   :  { %44 = dma.hbm_to_vmem [thread:$0]  %s4764_s1, 512, %s39_s14, [#allocation6], %s4142_s23, %s4142_s23, %s4143_s24  }
  0x15   :  { %s4144_s27 = smov [#allocation8]   ;;  %s4145_s29 = smov [#allocation2]  }
  0x16   :  { %s62_s28 = sshll.u32 %s4144_s27, 4  ;;  %s26_s30 = sshll.u32 %s4145_s29, 4  ;;  %s63_s28 = int_to_ptr.vmem [resolvable:$true] %s62_s28  ;;  %s27_s30 = int_to_ptr.vmem [resolvable:$true] %s26_s30 }
  0x17   :  { %s3977_s13 = scalar_lea.hbm %s4766_s3, 512 }
  0x18   :  { %p3978_p8 = scmp.ne.s32.totalorder %s4766_s3, %s3977_s13  ;;  %p3981_p9 = scmp.lt.u32.totalorder %s3977_s13, %s4766_s3 }
  0x1a   :  { %p3983_p10 = pnand %p3981_p9, %p3978_p8 }
  0x1c   :  { %3986 = shalt.err (!%p3983_p10)
}
  0x1d   :  { %s3987_s1 = scalar_lea.vmem %s63_s28, 512  ;;  %p3992_p12 = scmp.lt.s32.totalorder %s63_s28, %s63_s28 }
  0x1e   :  { %p3988_p11 = scmp.ne.s32.totalorder %s63_s28, %s3987_s1  ;;  %p3993_p13 = scmp.lt.s32.totalorder %s3987_s1, %s3987_s1 }
  0x20   :  { %p3994_p0 = por %p3993_p13, %p3992_p12 }
  0x22   :  { %p3995_p1 = pnand %p3994_p0, %p3988_p11 }
  0x24   :  { %3998 = shalt.err (!%p3995_p1)
}
  0x25   :  { %68 = dma.hbm_to_vmem [thread:$0]  %s4766_s3, 512, %s63_s28, [#allocation9], %s4142_s23, %s4142_s23, %s4143_s24  }
  0x26   :  { %s3999_s22 = scalar_lea.hbm %s4763_s0, 256 }
  0x27   :  { %p4000_p2 = scmp.ne.s32.totalorder %s4763_s0, %s3999_s22  ;;  %p4003_p3 = scmp.lt.u32.totalorder %s3999_s22, %s4763_s0 }
  0x29   :  { %p4005_p4 = pnand %p4003_p3, %p4000_p2 }
  0x2b   :  { %4008 = shalt.err (!%p4005_p4)
}
  0x2c   :  { %s4009_s11 = scalar_lea.vmem %s27_s30, 256  ;;  %p4014_p6 = scmp.lt.s32.totalorder %s27_s30, %s27_s30 }
  0x2d   :  { %p4010_p5 = scmp.ne.s32.totalorder %s27_s30, %s4009_s11  ;;  %p4015_p7 = scmp.lt.s32.totalorder %s4009_s11, %s4009_s11 }
  0x2f   :  { %p4016_p8 = por %p4015_p7, %p4014_p6 }
  0x31   :  { %p4017_p9 = pnand %p4016_p8, %p4010_p5 }
  0x33   :  { %4020 = shalt.err (!%p4017_p9)
}
  0x34   :  { %s4146_s3 = smov 32   ;;  %s4147_s28 = smov 2  }
  0x35   :  { %32 = dma.hbm_to_vmem [thread:$0]  %s4763_s0, 256, %s27_s30, [#allocation3], %s4146_s3, %s4146_s3, %s4147_s28  }
  0x36   :  { %s4148_s15 = smov [#allocation7]   ;;  %s4149_s17 = smov [#allocation10]  }
  0x37   :  { %s50_s16 = sshll.u32 %s4148_s15, 4  ;;  %s76_s18 = sshll.u32 %s4149_s17, 4  ;;  %s51_s16 = int_to_ptr.vmem [resolvable:$true] %s50_s16  ;;  %s77_s18 = int_to_ptr.vmem [resolvable:$true] %s76_s18 }
  0x38   :  { %s4021_s19 = scalar_lea.hbm %s4765_s2, 512 }
  0x39   :  { %p4022_p10 = scmp.ne.s32.totalorder %s4765_s2, %s4021_s19  ;;  %p4025_p11 = scmp.lt.u32.totalorder %s4021_s19, %s4765_s2 }
  0x3b   :  { %p4027_p12 = pnand %p4025_p11, %p4022_p10 }
  0x3d   :  { %4030 = shalt.err (!%p4027_p12)
}
  0x3e   :  { %s4031_s0 = scalar_lea.vmem %s51_s16, 512  ;;  %p4036_p0 = scmp.lt.s32.totalorder %s51_s16, %s51_s16 }
  0x3f   :  { %p4032_p13 = scmp.ne.s32.totalorder %s51_s16, %s4031_s0  ;;  %p4037_p1 = scmp.lt.s32.totalorder %s4031_s0, %s4031_s0 }
  0x41   :  { %p4038_p2 = por %p4037_p1, %p4036_p0 }
  0x43   :  { %p4039_p3 = pnand %p4038_p2, %p4032_p13 }
  0x45   :  { %4042 = shalt.err (!%p4039_p3)
}
  0x46   :  { %56 = dma.hbm_to_vmem [thread:$0]  %s4765_s2, 512, %s51_s16, [#allocation6], %s4142_s23, %s4142_s23, %s4143_s24  }
  0x47   :  { %s4043_s11 = scalar_lea.hbm %s4768_s5, 512 }
  0x48   :  { %p4044_p4 = scmp.ne.s32.totalorder %s4768_s5, %s4043_s11  ;;  %p4047_p5 = scmp.lt.u32.totalorder %s4043_s11, %s4768_s5 }
  0x4a   :  { %p4049_p6 = pnand %p4047_p5, %p4044_p4 }
  0x4c   :  { %4052 = shalt.err (!%p4049_p6)
}
  0x4d   :  { %s4053_s1 = scalar_lea.vmem %s77_s18, 512  ;;  %p4058_p8 = scmp.lt.s32.totalorder %s77_s18, %s77_s18 }
  0x4e   :  { %p4054_p7 = scmp.ne.s32.totalorder %s77_s18, %s4053_s1  ;;  %p4059_p9 = scmp.lt.s32.totalorder %s4053_s1, %s4053_s1 }
  0x50   :  { %p4060_p10 = por %p4059_p9, %p4058_p8 }
  0x52   :  { %p4061_p11 = pnand %p4060_p10, %p4054_p7 }
  0x54   :  { %4064 = shalt.err (!%p4061_p11)
}
  0x55   :  { %82 = dma.hbm_to_vmem [thread:$0]  %s4768_s5, 512, %s77_s18, [#allocation9], %s4142_s23, %s4142_s23, %s4143_s24  }
  0x56   :  { %4131 = dma.done.wait [#allocation3], 256  }
  0x57   :  { %4132 = vsyncadd [#allocation3], 4294967040 }
  0x58   :  { %4133 = dma.done.wait [#allocation6], 1024  }
  0x59   :  { %4134 = vsyncadd [#allocation6], 4294966272 }
  0x5a   :  { %4135 = dma.done.wait [#allocation9], 1024  }
  0x5b   :  { %4136 = vsyncadd [#allocation9], 4294966272  ;;  %v4150_v0 = vmov 0.0|0.0   ;;  %vm4151_vm0 = vmmov 0   ;;  %v4152_v1 = vmov 0.0   ;;  %v102_v2 = vld [vmem:[#allocation5] sm:$0xff] }
  0x5c   :  { %3578 = vmatprep.subr.bf16.mxu0 %v4150_v0  ;;  %3234 = vmatprep.mubr.msk.f32.mxu0 %vm4151_vm0, %v4152_v1  ;;  %v103_v3 = vld [vmem:[#allocation5 + $0x8] sm:$0xff]  ;;  %v104_v4 = vld [vmem:[#allocation5 + $0x10] sm:$0xff]  ;;  %v105_v6 = vld [vmem:[#allocation5 + $0x18] sm:$0xff]  ;;  %vm123_vm1 = vcmask 261120   ;;  %s4153_s24 = smov 64   ;;  %vm930_vm2 = vcmask 254976  }
  0x5d   :  { %3584 = vmatprep.subr.bf16.mxu1 %v4150_v0  ;;  %3245 = vmatprep.mubr.msk.f32.mxu1 %vm4151_vm0, %v4152_v1  ;;  %v4294_v5 = vpack.c.bf16 %v103_v3, %v102_v2  ;;  %v4297_v7 = vpack.c.bf16 %v105_v6, %v104_v4  ;;  %v121_v8 = vld [vmem:[%s4769_s6] sm:$0x3]  ;;  %v108_v29 = vld [vmem:[#allocation2 + $0x2] sm:$0x3]  ;;  %v110_v47 = vld [vmem:[#allocation2 + $0x4] sm:$0x3] }
  0x5e   :  { %v106_v9 = vld [vmem:[#allocation2] sm:$0x3]  ;;  %v112_v3 = vld [vmem:[#allocation2 + $0x6] sm:$0x3] }
  0x5f   :  { %3580 = vmatpush3.bf16.msra.mxu0 %v4294_v5  ;;  %3586 = vmatpush3.bf16.msra.mxu1 %v4294_v5  ;;  %v122_v14 = vld [vmem:[%s4770_s7] sm:$0x3] }
  0x60   :  { %3581 = vmatprep.subr.bf16.mxu0 %v4150_v0  ;;  %3587 = vmatprep.subr.bf16.mxu1 %v4150_v0 }
  0x63   :  { %3583 = vmatpush3.bf16.msra.mxu0 %v4297_v7  ;;  %3589 = vmatpush3.bf16.msra.mxu1 %v4297_v7 }
  0x64   :  { %3590 = vmatprep.subr.bf16.mxu0 %v4150_v0  ;;  %3596 = vmatprep.subr.bf16.mxu1 %v4150_v0 }
  0x66   :  { %3235 = vmatmul.mubr.msk.f32.vlgmr.msra.gmra.mrb[0].mxu0 %vm123_vm1, %v121_v8 }
  0x67   :  { %3592 = vmatpush3.bf16.msra.mxu0 %v4294_v5  ;;  %3256 = vmatprep.mubr.msk.f32.mxu0 %vm4151_vm0, %v4152_v1 }
  0x68   :  { %3593 = vmatprep.subr.bf16.mxu0 %v4150_v0 }
  0x6b   :  { %3595 = vmatpush3.bf16.msra.mxu0 %v4297_v7 }
  0x6c   :  { %3602 = vmatprep.subr.bf16.mxu0 %v4150_v0 }
 0x139   :  { %v193_v10 = vpop.f32.mrb[0].mxu0 }
 0x13a   :  { %v197_v11 = vadd.f32 %v193_v10, %v106_v9  ;;  %v3236_v12 = vpop.f32.mrb[1].mxu0 }
 0x13c   :  { %3827 = vtanh.f32 %v197_v11  ;;  %v3015_v15 = vmul.f32 -1.442695, %v197_v11 }
 0x13e   :  { %3829 = vpow2.f32 %v3015_v15 }
 0x146   :  { %v3828_v13 = vpop.eup %3827 }
 0x147   :  { %211 = vrot.lane.b32.xlu0 %v3828_v13, %s4153_s24 }
 0x148   :  { %v3830_v16 = vpop.eup %3829 }
 0x149   :  { %v201_v17 = vadd.f32 1.0, %v3830_v16 }
 0x14b   :  { %206 = vrot.lane.b32.xlu0 %v122_v14, %s4146_s3  ;;  %3831 = vrcp.f32 %v201_v17 }
 0x155   :  { %v3832_v18 = vpop.eup %3831 }
 0x1b9   :  { %v212_v19 = vpop.permute.xlu0 %211 }
 0x1ba   :  { %v214_v20 = vmul.f32 %v3832_v18, %v212_v19 }
 0x1bc   :  { %216 = vrot.lane.b32.xlu1 %v214_v20, %s4146_s3 }
 0x1bd   :  { %v207_v21 = vpop.permute.xlu0 %206 }
 0x1be   :  { %v209_v22 = vmul.f32 %v3832_v18, %v207_v21 }
 0x22e   :  { %v217_v23 = vpop.permute.xlu1 %216 }
 0x22f   :  { %v219_v24 = vadd.f32 %v217_v23, %v209_v22  ;;  %v114_v23 = vld [vmem:[#allocation2 + $0x8] sm:$0x3] }
 0x231   :  { %3833 = vtanh.f32 %v219_v24 }
 0x23b   :  { %v3834_v25 = vpop.eup %3833 }
 0x23c   :  { %222 = vrot.lane.b32.xlu1 %v3834_v25, %s4153_s24 }
 0x2ae   :  { %v223_v26 = vpop.permute.xlu1 %222 }
 0x2af   :  { %v225_v27 = vmul.f32 %v3832_v18, %v223_v26 }
 0x2b1   :  { %227 = vrot.lane.b32.xlu0 %v225_v27, %s4146_s3 }
 0x323   :  { %v4324_v28 = vpop.permute.xlu0 %227 }
 0x324   :  { %3246 = vmatmul.mubr.msk.f32.vlgmr.msra.gmra.mrb[0].mxu1 %vm123_vm1, %v4324_v28 }
 0x325   :  { %3598 = vmatpush3.bf16.msra.mxu1 %v4294_v5  ;;  %3267 = vmatprep.mubr.msk.f32.mxu1 %vm4151_vm0, %v4152_v1 }
 0x326   :  { %3599 = vmatprep.subr.bf16.mxu1 %v4150_v0 }
 0x329   :  { %3601 = vmatpush3.bf16.msra.mxu1 %v4297_v7 }
 0x32a   :  { %3608 = vmatprep.subr.bf16.mxu1 %v4150_v0 }
 0x3f7   :  { %v297_v30 = vpop.f32.mrb[0].mxu1 }
 0x3f8   :  { %v301_v31 = vadd.f32 %v297_v30, %v108_v29  ;;  %v3247_v32 = vpop.f32.mrb[1].mxu1 }
 0x3fa   :  { %3835 = vtanh.f32 %v301_v31  ;;  %v3017_v34 = vmul.f32 -1.442695, %v301_v31 }
 0x3fc   :  { %3837 = vpow2.f32 %v3017_v34 }
 0x404   :  { %v3836_v33 = vpop.eup %3835 }
 0x405   :  { %311 = vrot.lane.b32.xlu1 %v3836_v33, %s4153_s24 }
 0x406   :  { %v3838_v35 = vpop.eup %3837 }
 0x407   :  { %v305_v36 = vadd.f32 1.0, %v3838_v35 }
 0x409   :  { %3839 = vrcp.f32 %v305_v36 }
 0x413   :  { %v3840_v37 = vpop.eup %3839 }
 0x414   :  { %v309_v40 = vmul.f32 %v3840_v37, %v219_v24 }
 0x477   :  { %v312_v38 = vpop.permute.xlu1 %311 }
 0x478   :  { %v314_v39 = vmul.f32 %v3840_v37, %v312_v38 }
 0x47a   :  { %316 = vrot.lane.b32.xlu0 %v314_v39, %s4146_s3 }
 0x4ec   :  { %v317_v41 = vpop.permute.xlu0 %316 }
 0x4ed   :  { %v319_v42 = vadd.f32 %v317_v41, %v309_v40 }
 0x4ef   :  { %3841 = vtanh.f32 %v319_v42 }
 0x4f9   :  { %v3842_v43 = vpop.eup %3841 }
 0x4fa   :  { %322 = vrot.lane.b32.xlu1 %v3842_v43, %s4153_s24 }
 0x56c   :  { %v323_v44 = vpop.permute.xlu1 %322 }
 0x56d   :  { %v325_v45 = vmul.f32 %v3840_v37, %v323_v44 }
 0x56f   :  { %327 = vrot.lane.b32.xlu0 %v325_v45, %s4146_s3 }
 0x5e1   :  { %v4338_v46 = vpop.permute.xlu0 %327 }
 0x5e2   :  { %3257 = vmatmul.mubr.msk.f32.vlgmr.msra.gmra.mrb[2].mxu0 %vm123_vm1, %v4338_v46 }
 0x5e3   :  { %3604 = vmatpush3.bf16.msra.mxu0 %v4294_v5  ;;  %3278 = vmatprep.mubr.msk.f32.mxu0 %vm4151_vm0, %v4152_v1 }
 0x5e4   :  { %3605 = vmatprep.subr.bf16.mxu0 %v4150_v0 }
 0x5e7   :  { %3607 = vmatpush3.bf16.msra.mxu0 %v4297_v7 }
 0x5e8   :  { %3614 = vmatprep.subr.bf16.mxu0 %v4150_v0 }
 0x6b5   :  { %v397_v48 = vpop.f32.mrb[2].mxu0 }
 0x6b6   :  { %v401_v49 = vadd.f32 %v397_v48, %v110_v47  ;;  %v3258_v50 = vpop.f32.mrb[3].mxu0 }
 0x6b8   :  { %3843 = vtanh.f32 %v401_v49  ;;  %v3019_v52 = vmul.f32 -1.442695, %v401_v49 }
 0x6ba   :  { %3845 = vpow2.f32 %v3019_v52 }
 0x6c2   :  { %v3844_v51 = vpop.eup %3843 }
 0x6c3   :  { %411 = vrot.lane.b32.xlu1 %v3844_v51, %s4153_s24 }
 0x6c4   :  { %v3846_v53 = vpop.eup %3845 }
 0x6c5   :  { %v405_v54 = vadd.f32 1.0, %v3846_v53 }
 0x6c7   :  { %3847 = vrcp.f32 %v405_v54 }
 0x6d1   :  { %v3848_v55 = vpop.eup %3847 }
 0x6d2   :  { %v409_v58 = vmul.f32 %v3848_v55, %v319_v42  ;;  %v116_v42 = vld [vmem:[#allocation2 + $0xa] sm:$0x3] }
 0x735   :  { %v412_v56 = vpop.permute.xlu1 %411 }
 0x736   :  { %v414_v57 = vmul.f32 %v3848_v55, %v412_v56 }
 0x738   :  { %416 = vrot.lane.b32.xlu0 %v414_v57, %s4146_s3 }
 0x7aa   :  { %v417_v59 = vpop.permute.xlu0 %416 }
 0x7ab   :  { %v419_v60 = vadd.f32 %v417_v59, %v409_v58  ;;  %v118_v59 = vld [vmem:[#allocation2 + $0xc] sm:$0x3] }
 0x7ad   :  { %3849 = vtanh.f32 %v419_v60 }
 0x7b7   :  { %v3850_v61 = vpop.eup %3849 }
 0x7b8   :  { %422 = vrot.lane.b32.xlu1 %v3850_v61, %s4153_s24 }
 0x82a   :  { %v423_v62 = vpop.permute.xlu1 %422 }
 0x82b   :  { %v425_v63 = vmul.f32 %v3848_v55, %v423_v62 }
 0x82d   :  { %427 = vrot.lane.b32.xlu0 %v425_v63, %s4146_s3 }
 0x89f   :  { %v4352_v2 = vpop.permute.xlu0 %427 }
 0x8a0   :  { %3268 = vmatmul.mubr.msk.f32.vlgmr.msra.gmra.mrb[2].mxu1 %vm123_vm1, %v4352_v2 }
 0x8a1   :  { %3610 = vmatpush3.bf16.msra.mxu1 %v4294_v5  ;;  %3289 = vmatprep.mubr.msk.f32.mxu1 %vm4151_vm0, %v4152_v1 }
 0x8a2   :  { %3611 = vmatprep.subr.bf16.mxu1 %v4150_v0 }
 0x8a5   :  { %3613 = vmatpush3.bf16.msra.mxu1 %v4297_v7 }
 0x8a6   :  { %3620 = vmatprep.subr.bf16.mxu1 %v4150_v0 }
 0x973   :  { %v497_v4 = vpop.f32.mrb[2].mxu1 }
 0x974   :  { %v501_v6 = vadd.f32 %v497_v4, %v112_v3  ;;  %v3269_v8 = vpop.f32.mrb[3].mxu1 }
 0x976   :  { %3851 = vtanh.f32 %v501_v6  ;;  %v3021_v10 = vmul.f32 -1.442695, %v501_v6 }
 0x978   :  { %3853 = vpow2.f32 %v3021_v10 }
 0x980   :  { %v3852_v9 = vpop.eup %3851 }
 0x981   :  { %511 = vrot.lane.b32.xlu1 %v3852_v9, %s4153_s24 }
 0x982   :  { %v3854_v11 = vpop.eup %3853 }
 0x983   :  { %v505_v12 = vadd.f32 1.0, %v3854_v11 }
 0x985   :  { %3855 = vrcp.f32 %v505_v12 }
 0x98f   :  { %v3856_v13 = vpop.eup %3855 }
 0x990   :  { %v509_v16 = vmul.f32 %v3856_v13, %v419_v60 }
 0x9f3   :  { %v512_v14 = vpop.permute.xlu1 %511 }
 0x9f4   :  { %v514_v15 = vmul.f32 %v3856_v13, %v512_v14 }
 0x9f6   :  { %516 = vrot.lane.b32.xlu0 %v514_v15, %s4146_s3  ;;  %v941_v15 = vld [vmem:[#allocation8] sm:$0xff] }
 0xa68   :  { %v517_v17 = vpop.permute.xlu0 %516 }
 0xa69   :  { %v519_v18 = vadd.f32 %v517_v17, %v509_v16  ;;  %v942_v16 = vld [vmem:[#allocation8 + $0x8] sm:$0xff] }
 0xa6a   :  { %v4406_v17 = vpack.c.bf16 %v942_v16, %v941_v15 }
 0xa6b   :  { %3857 = vtanh.f32 %v519_v18 }
 0xa75   :  { %v3858_v19 = vpop.eup %3857 }
 0xa76   :  { %522 = vrot.lane.b32.xlu1 %v3858_v19, %s4153_s24  ;;  %v944_v19 = vld [vmem:[#allocation8 + $0x18] sm:$0xff] }
 0xae8   :  { %v523_v20 = vpop.permute.xlu1 %522 }
 0xae9   :  { %v525_v21 = vmul.f32 %v3856_v13, %v523_v20 }
 0xaeb   :  { %527 = vrot.lane.b32.xlu0 %v525_v21, %s4146_s3 }
 0xb5d   :  { %v4366_v22 = vpop.permute.xlu0 %527 }
 0xb5e   :  { %3279 = vmatmul.mubr.msk.f32.vlgmr.msra.gmra.mrb[4].mxu0 %vm123_vm1, %v4366_v22 }
 0xb5f   :  { %3616 = vmatpush3.bf16.msra.mxu0 %v4294_v5  ;;  %3300 = vmatprep.mubr.msk.f32.mxu0 %vm4151_vm0, %v4152_v1 }
 0xb60   :  { %3617 = vmatprep.subr.bf16.mxu0 %v4150_v0 }
 0xb63   :  { %3619 = vmatpush3.bf16.msra.mxu0 %v4297_v7 }
 0xb64   :  { %3626 = vmatprep.subr.bf16.mxu0 %v4150_v0 }
 0xc31   :  { %v597_v24 = vpop.f32.mrb[4].mxu0 }
 0xc32   :  { %v601_v25 = vadd.f32 %v597_v24, %v114_v23  ;;  %v3280_v26 = vpop.f32.mrb[5].mxu0 }
 0xc33   :  { %v938_v26 = vld [vmem:[#allocation7 + $0x8] sm:$0xff] }
 0xc34   :  { %3859 = vtanh.f32 %v601_v25  ;;  %v3023_v29 = vmul.f32 -1.442695, %v601_v25  ;;  %v937_v25 = vld [vmem:[#allocation7] sm:$0xff] }
 0xc36   :  { %3861 = vpow2.f32 %v3023_v29  ;;  %v939_v29 = vld [vmem:[#allocation7 + $0x10] sm:$0xff] }
 0xc3e   :  { %v3860_v27 = vpop.eup %3859 }
 0xc3f   :  { %611 = vrot.lane.b32.xlu1 %v3860_v27, %s4153_s24  ;;  %v4424_v27 = vpack.c.bf16 %v938_v26, %v937_v25 }
 0xc40   :  { %v3862_v30 = vpop.eup %3861 }
 0xc41   :  { %v605_v31 = vadd.f32 1.0, %v3862_v30  ;;  %v940_v30 = vld [vmem:[#allocation7 + $0x18] sm:$0xff] }
 0xc43   :  { %3863 = vrcp.f32 %v605_v31  ;;  %v4430_v31 = vpack.c.bf16 %v940_v30, %v939_v29 }
 0xc4d   :  { %v3864_v32 = vpop.eup %3863 }
 0xc4e   :  { %v609_v35 = vmul.f32 %v3864_v32, %v519_v18  ;;  %v943_v18 = vld [vmem:[#allocation8 + $0x10] sm:$0xff] }
 0xc4f   :  { %v4410_v20 = vpack.c.bf16 %v944_v19, %v943_v18 }
 0xcb1   :  { %v612_v33 = vpop.permute.xlu1 %611 }
 0xcb2   :  { %v614_v34 = vmul.f32 %v3864_v32, %v612_v33 }
 0xcb4   :  { %616 = vrot.lane.b32.xlu0 %v614_v34, %s4146_s3 }
 0xd26   :  { %v617_v36 = vpop.permute.xlu0 %616 }
 0xd27   :  { %v619_v37 = vadd.f32 %v617_v36, %v609_v35 }
 0xd29   :  { %3865 = vtanh.f32 %v619_v37 }
 0xd33   :  { %v3866_v38 = vpop.eup %3865 }
 0xd34   :  { %622 = vrot.lane.b32.xlu1 %v3866_v38, %s4153_s24 }
 0xda6   :  { %v623_v39 = vpop.permute.xlu1 %622 }
 0xda7   :  { %v625_v40 = vmul.f32 %v3864_v32, %v623_v39  ;;  %v120_v32 = vld [vmem:[#allocation2 + $0xe] sm:$0x3] }
 0xda9   :  { %627 = vrot.lane.b32.xlu0 %v625_v40, %s4146_s3 }
 0xe1b   :  { %v4380_v41 = vpop.permute.xlu0 %627 }
 0xe1c   :  { %3290 = vmatmul.mubr.msk.f32.vlgmr.msra.gmra.mrb[4].mxu1 %vm123_vm1, %v4380_v41 }
 0xe1d   :  { %3622 = vmatpush3.bf16.msra.mxu1 %v4294_v5  ;;  %3311 = vmatprep.mubr.msk.f32.mxu1 %vm4151_vm0, %v4152_v1 }
 0xe1e   :  { %3623 = vmatprep.subr.bf16.mxu1 %v4150_v0 }
 0xe21   :  { %3625 = vmatpush3.bf16.msra.mxu1 %v4297_v7 }
 0xe22   :  { %3638 = vmatprep.subr.bf16.mxu1 %v4150_v0 }
 0xeef   :  { %v697_v43 = vpop.f32.mrb[4].mxu1 }
 0xef0   :  { %v701_v44 = vadd.f32 %v697_v43, %v116_v42  ;;  %v3291_v45 = vpop.f32.mrb[5].mxu1 }
 0xef2   :  { %3867 = vtanh.f32 %v701_v44  ;;  %v3025_v48 = vmul.f32 -1.442695, %v701_v44 }
 0xef4   :  { %3869 = vpow2.f32 %v3025_v48 }
 0xefc   :  { %v3868_v47 = vpop.eup %3867 }
 0xefd   :  { %711 = vrot.lane.b32.xlu1 %v3868_v47, %s4153_s24 }
 0xefe   :  { %v3870_v5 = vpop.eup %3869 }
 0xeff   :  { %v705_v49 = vadd.f32 1.0, %v3870_v5 }
 0xf01   :  { %3871 = vrcp.f32 %v705_v49 }
 0xf0b   :  { %v3872_v50 = vpop.eup %3871 }
 0xf0c   :  { %v709_v7 = vmul.f32 %v3872_v50, %v619_v37 }
 0xf6f   :  { %v712_v51 = vpop.permute.xlu1 %711 }
 0xf70   :  { %v714_v52 = vmul.f32 %v3872_v50, %v712_v51  ;;  %v2082_v51 = vld [vmem:[#allocation10] sm:$0xff] }
 0xf72   :  { %716 = vrot.lane.b32.xlu0 %v714_v52, %s4146_s3  ;;  %v2083_v52 = vld [vmem:[#allocation10 + $0x8] sm:$0xff] }
 0xfe4   :  { %v717_v53 = vpop.permute.xlu0 %716 }
 0xfe5   :  { %v719_v54 = vadd.f32 %v717_v53, %v709_v7  ;;  %v4499_v53 = vpack.c.bf16 %v2083_v52, %v2082_v51 }
 0xfe7   :  { %3873 = vtanh.f32 %v719_v54 }
 0xff1   :  { %v3874_v55 = vpop.eup %3873 }
 0xff2   :  { %722 = vrot.lane.b32.xlu1 %v3874_v55, %s4153_s24  ;;  %v2085_v55 = vld [vmem:[#allocation10 + $0x18] sm:$0xff] }
0x1064   :  { %v723_v56 = vpop.permute.xlu1 %722 }
0x1065   :  { %v725_v57 = vmul.f32 %v3872_v50, %v723_v56  ;;  %v3048_v50 = vld [vmem:[%s4770_s7 + $0x2] sm:$0x3] }
0x1067   :  { %727 = vrot.lane.b32.xlu0 %v725_v57, %s4146_s3 }
0x10d9   :  { %v4394_v58 = vpop.permute.xlu0 %727 }
0x10da   :  { %3301 = vmatmul.mubr.msk.f32.vlgmr.msra.gmra.mrb[6].mxu0 %vm123_vm1, %v4394_v58 }
0x10db   :  { %3322 = vmatprep.mubr.msk.f32.mxu0 %vm4151_vm0, %v4152_v1  ;;  %3628 = vmatpush3.bf16.msra.mxu0 %v4406_v17 }
0x10dc   :  { %3629 = vmatprep.subr.bf16.mxu0 %v4150_v0 }
0x10df   :  { %3631 = vmatpush3.bf16.msra.mxu0 %v4410_v20 }
0x10e0   :  { %3632 = vmatprep.subr.bf16.mxu0 %v4150_v0 }
0x11ad   :  { %v797_v60 = vpop.f32.mrb[6].mxu0 }
0x11ae   :  { %v801_v61 = vadd.f32 %v797_v60, %v118_v59  ;;  %v3302_v62 = vpop.f32.mrb[7].mxu0 }
0x11b0   :  { %3875 = vtanh.f32 %v801_v61  ;;  %v3027_v3 = vmul.f32 -1.442695, %v801_v61 }
0x11b2   :  { %3877 = vpow2.f32 %v3027_v3 }
0x11ba   :  { %v3876_v63 = vpop.eup %3875 }
0x11bb   :  { %811 = vrot.lane.b32.xlu1 %v3876_v63, %s4153_s24 }
0x11bc   :  { %v3878_v4 = vpop.eup %3877 }
0x11bd   :  { %v805_v6 = vadd.f32 1.0, %v3878_v4 }
0x11bf   :  { %3879 = vrcp.f32 %v805_v6 }
0x11c9   :  { %v3880_v8 = vpop.eup %3879 }
0x11ca   :  { %v809_v11 = vmul.f32 %v3880_v8, %v719_v54  ;;  %v2084_v54 = vld [vmem:[#allocation10 + $0x10] sm:$0xff] }
0x11cb   :  { %v4510_v56 = vpack.c.bf16 %v2085_v55, %v2084_v54 }
0x122d   :  { %v812_v9 = vpop.permute.xlu1 %811 }
0x122e   :  { %v814_v10 = vmul.f32 %v3880_v8, %v812_v9 }
0x1230   :  { %816 = vrot.lane.b32.xlu0 %v814_v10, %s4146_s3 }
0x12a2   :  { %v817_v12 = vpop.permute.xlu0 %816 }
0x12a3   :  { %v4402_v13 = vadd.f32 %v817_v12, %v809_v11 }
0x12a5   :  { %3881 = vtanh.f32 %v4402_v13 }
0x12af   :  { %v3882_v14 = vpop.eup %3881 }
0x12b0   :  { %822 = vrot.lane.b32.xlu1 %v3882_v14, %s4153_s24 }
0x1322   :  { %v823_v21 = vpop.permute.xlu1 %822 }
0x1323   :  { %v825_v23 = vmul.f32 %v3880_v8, %v823_v21 }
0x1325   :  { %827 = vrot.lane.b32.xlu0 %v825_v23, %s4146_s3 }
0x1397   :  { %v4415_v24 = vpop.permute.xlu0 %827 }
0x1398   :  { %3312 = vmatmul.mubr.msk.f32.vlgmr.msra.gmra.mrb[6].mxu1 %vm123_vm1, %v4415_v24 }
0x1399   :  { %3640 = vmatpush3.bf16.msra.mxu1 %v4406_v17  ;;  %3344 = vmatprep.mubr.msk.f32.mxu1 %vm4151_vm0, %v4152_v1 }
0x139a   :  { %3641 = vmatprep.subr.bf16.mxu1 %v4150_v0 }
0x139d   :  { %3643 = vmatpush3.bf16.msra.mxu1 %v4410_v20 }
0x139e   :  { %3644 = vmatprep.subr.bf16.mxu1 %v4150_v0 }
0x13a0   :  { %3345 = vmatmul.mubr.msk.f32.vlgmr.msra.gmra.mrb[8].mxu1 %vm123_vm1, %v4415_v24 }
0x13a1   :  { %3646 = vmatpush3.bf16.msra.mxu1 %v4424_v27  ;;  %3355 = vmatprep.mubr.msk.f32.mxu1 %vm4151_vm0, %v4152_v1 }
0x13a2   :  { %3647 = vmatprep.subr.bf16.mxu1 %v4150_v0 }
0x13a5   :  { %3649 = vmatpush3.bf16.msra.mxu1 %v4430_v31 }
0x13a6   :  { %3662 = vmatprep.subr.bf16.mxu1 %v4150_v0 }
0x13a8   :  { %3356 = vmatmul.mubr.msk.f32.vlgmr.msra.gmra.mrb[8].mxu1 %vm123_vm1, %v4338_v46 }
0x13a9   :  { %3664 = vmatpush3.bf16.msra.mxu1 %v4406_v17  ;;  %3388 = vmatprep.mubr.msk.f32.mxu1 %vm4151_vm0, %v4152_v1 }
0x13aa   :  { %3665 = vmatprep.subr.bf16.mxu1 %v4150_v0 }
0x13ad   :  { %3667 = vmatpush3.bf16.msra.mxu1 %v4410_v20 }
0x13ae   :  { %3668 = vmatprep.subr.bf16.mxu1 %v4150_v0 }
0x13b0   :  { %3389 = vmatmul.mubr.msk.f32.vlgmr.msra.gmra.mrb[10].mxu1 %vm123_vm1, %v4380_v41 }
0x13b1   :  { %3670 = vmatpush3.bf16.msra.mxu1 %v4424_v27  ;;  %3399 = vmatprep.mubr.msk.f32.mxu1 %vm4151_vm0, %v4152_v1 }
0x13b2   :  { %3671 = vmatprep.subr.bf16.mxu1 %v4150_v0 }
0x13b5   :  { %3673 = vmatpush3.bf16.msra.mxu1 %v4430_v31 }
0x13b6   :  { %3686 = vmatprep.subr.bf16.mxu1 %v4150_v0 }
0x13b8   :  { %3400 = vmatmul.mubr.msk.f32.vlgmr.msra.gmra.mrb[10].mxu1 %vm123_vm1, %v4366_v22 }
0x13b9   :  { %3688 = vmatpush3.bf16.msra.mxu1 %v4406_v17  ;;  %3432 = vmatprep.mubr.msk.f32.mxu1 %vm4151_vm0, %v4152_v1 }
0x13ba   :  { %3689 = vmatprep.subr.bf16.mxu1 %v4150_v0 }
0x13bd   :  { %3691 = vmatpush3.bf16.msra.mxu1 %v4410_v20 }
0x13be   :  { %3692 = vmatprep.subr.bf16.mxu1 %v4150_v0 }
0x13c0   :  { %3433 = vmatmul.mubr.msk.f32.vlgmr.msra.gmra.mrb[12].mxu1 %vm123_vm1, %v4352_v2 }
0x13c1   :  { %3694 = vmatpush3.bf16.msra.mxu1 %v4424_v27  ;;  %3443 = vmatprep.mubr.msk.f32.mxu1 %vm4151_vm0, %v4152_v1 }
0x13c2   :  { %3695 = vmatprep.subr.bf16.mxu1 %v4150_v0 }
0x13c5   :  { %3697 = vmatpush3.bf16.msra.mxu1 %v4430_v31 }
0x13c6   :  { %3710 = vmatprep.subr.bf16.mxu1 %v4150_v0 }
0x13c8   :  { %3444 = vmatmul.mubr.msk.f32.vlgmr.msra.gmra.mrb[12].mxu1 %vm123_vm1, %v4394_v58 }
0x13c9   :  { %3712 = vmatpush3.bf16.msra.mxu1 %v4406_v17  ;;  %3476 = vmatprep.mubr.msk.f32.mxu1 %vm4151_vm0, %v4152_v1 }
0x13ca   :  { %3713 = vmatprep.subr.bf16.mxu1 %v4150_v0 }
0x13cd   :  { %3715 = vmatpush3.bf16.msra.mxu1 %v4410_v20 }
0x13ce   :  { %3716 = vmatprep.subr.bf16.mxu1 %v4150_v0 }
0x13d0   :  { %3477 = vmatmul.mubr.msk.f32.vlgmr.msra.gmra.mrb[14].mxu1 %vm123_vm1, %v4324_v28 }
0x13d1   :  { %3718 = vmatpush3.bf16.msra.mxu1 %v4424_v27  ;;  %3487 = vmatprep.mubr.msk.f32.mxu1 %vm4151_vm0, %v4152_v1 }
0x13d2   :  { %3719 = vmatprep.subr.bf16.mxu1 %v4150_v0 }
0x13d5   :  { %3721 = vmatpush3.bf16.msra.mxu1 %v4430_v31 }
0x13d6   :  { %3728 = vmatprep.subr.bf16.mxu1 %v4150_v0 }
0x146b   :  { %v897_v33 = vpop.f32.mrb[6].mxu1 }
0x146c   :  { %v901_v34 = vadd.f32 %v897_v33, %v120_v32  ;;  %v3313_v35 = vpop.f32.mrb[7].mxu1 }
0x146e   :  { %3883 = vtanh.f32 %v901_v34  ;;  %v3029_v37 = vmul.f32 -1.442695, %v901_v34 }
0x1470   :  { %3885 = vpow2.f32 %v3029_v37 }
0x1478   :  { %v3884_v36 = vpop.eup %3883 }
0x1479   :  { %911 = vrot.lane.b32.xlu1 %v3884_v36, %s4153_s24 }
0x147a   :  { %v3886_v38 = vpop.eup %3885 }
0x147b   :  { %v905_v39 = vadd.f32 1.0, %v3886_v38 }
0x147d   :  { %3887 = vrcp.f32 %v905_v39 }
0x1487   :  { %v3888_v40 = vpop.eup %3887 }
0x1488   :  { %v909_v44 = vmul.f32 %v3888_v40, %v4402_v13 }
0x14eb   :  { %v912_v42 = vpop.permute.xlu1 %911 }
0x14ec   :  { %v914_v43 = vmul.f32 %v3888_v40, %v912_v42 }
0x14ee   :  { %916 = vrot.lane.b32.xlu0 %v914_v43, %s4146_s3 }
0x1560   :  { %v917_v45 = vpop.permute.xlu0 %916 }
0x1561   :  { %v4488_v47 = vadd.f32 %v917_v45, %v909_v44 }
0x1563   :  { %3889 = vtanh.f32 %v4488_v47 }
0x156d   :  { %v3890_v48 = vpop.eup %3889 }
0x156e   :  { %922 = vrot.lane.b32.xlu1 %v3890_v48, %s4153_s24 }
0x15e0   :  { %v923_v5 = vpop.permute.xlu1 %922 }
0x15e1   :  { %v925_v49 = vmul.f32 %v3888_v40, %v923_v5 }
0x15e3   :  { %927 = vrot.lane.b32.xlu0 %v925_v49, %s4146_s3 }
0x15e7   :  { %2172 = vrot.lane.b32.xlu0 %v3048_v50, %s4146_s3 }
0x1655   :  { %v928_v7 = vpop.permute.xlu0 %927 }
0x1656   :  { %3323 = vmatmul.mubr.msk.f32.vlgmr.msra.gmra.mrb[8].mxu0 %vm123_vm1, %v928_v7  ;;  %3488 = vmatmul.mubr.msk.f32.vlgmr.msra.gmra.mrb[14].mxu1 %vm123_vm1, %v928_v7  ;;  %931 = vst.msk [vmem:[#allocation12] sm:$0x3] %vm930_vm2, %v928_v7 }
0x1657   :  { %3634 = vmatpush3.bf16.msra.mxu0 %v4424_v27  ;;  %3333 = vmatprep.mubr.msk.f32.mxu0 %vm4151_vm0, %v4152_v1 }
0x1658   :  { %3635 = vmatprep.subr.bf16.mxu0 %v4150_v0  ;;  %3730 = vmatpush3.bf16.msra.mxu1 %v4499_v53 }
0x1659   :  { %3731 = vmatprep.subr.bf16.mxu1 %v4150_v0  ;;  %3509 = vmatprep.mubr.msk.f32.mxu1 %vm4151_vm0, %v4152_v1  ;;  %v2173_v3 = vpop.permute.xlu0 %2172 }
0x165b   :  { %3637 = vmatpush3.bf16.msra.mxu0 %v4430_v31 }
0x165c   :  { %3650 = vmatprep.subr.bf16.mxu0 %v4150_v0  ;;  %3733 = vmatpush3.bf16.msra.mxu1 %v4510_v56 }
0x165d   :  { %3740 = vmatprep.subr.bf16.mxu1 %v4150_v0 }
0x165e   :  { %3334 = vmatmul.mubr.msk.f32.vlgmr.msra.gmra.mrb[8].mxu0 %vm123_vm1, %v4324_v28  ;;  %v3047_v28 = vld [vmem:[%s4769_s6 + $0x2] sm:$0x3]  ;;  %s4155_s6 = smov [#allocation12]  }
0x165f   :  { %3652 = vmatpush3.bf16.msra.mxu0 %v4406_v17  ;;  %3366 = vmatprep.mubr.msk.f32.mxu0 %vm4151_vm0, %v4152_v1  ;;  %s2981_s0 = sshll.u32 %s4155_s6, 4  ;;  %s2982_s0 = int_to_ptr.vmem [resolvable:$true] %s2981_s0 }
0x1660   :  { %3653 = vmatprep.subr.bf16.mxu0 %v4150_v0  ;;  %s4065_s30 = scalar_lea.vmem %s2982_s0, 64  ;;  %p4070_p13 = scmp.lt.s32.totalorder %s2982_s0, %s2982_s0 }
0x1661   :  { %p4066_p12 = scmp.ne.s32.totalorder %s2982_s0, %s4065_s30  ;;  %p4071_p0 = scmp.lt.s32.totalorder %s4065_s30, %s4065_s30 }
0x1663   :  { %3655 = vmatpush3.bf16.msra.mxu0 %v4410_v20  ;;  %p4072_p1 = por %p4071_p0, %p4070_p13 }
0x1664   :  { %3656 = vmatprep.subr.bf16.mxu0 %v4150_v0 }
0x1665   :  { %p4073_p2 = pnand %p4072_p1, %p4066_p12 }
0x1666   :  { %3367 = vmatmul.mubr.msk.f32.vlgmr.msra.gmra.mrb[10].mxu0 %vm123_vm1, %v4394_v58 }
0x1667   :  { %3658 = vmatpush3.bf16.msra.mxu0 %v4424_v27  ;;  %3377 = vmatprep.mubr.msk.f32.mxu0 %vm4151_vm0, %v4152_v1 }
0x1668   :  { %3659 = vmatprep.subr.bf16.mxu0 %v4150_v0 }
0x166b   :  { %3661 = vmatpush3.bf16.msra.mxu0 %v4430_v31 }
0x166c   :  { %3674 = vmatprep.subr.bf16.mxu0 %v4150_v0 }
0x166e   :  { %3378 = vmatmul.mubr.msk.f32.vlgmr.msra.gmra.mrb[10].mxu0 %vm123_vm1, %v4352_v2 }
0x166f   :  { %3676 = vmatpush3.bf16.msra.mxu0 %v4406_v17  ;;  %3410 = vmatprep.mubr.msk.f32.mxu0 %vm4151_vm0, %v4152_v1 }
0x1670   :  { %3677 = vmatprep.subr.bf16.mxu0 %v4150_v0 }
0x1673   :  { %3679 = vmatpush3.bf16.msra.mxu0 %v4410_v20 }
0x1674   :  { %3680 = vmatprep.subr.bf16.mxu0 %v4150_v0 }
0x1676   :  { %3411 = vmatmul.mubr.msk.f32.vlgmr.msra.gmra.mrb[12].mxu0 %vm123_vm1, %v4366_v22 }
0x1677   :  { %3682 = vmatpush3.bf16.msra.mxu0 %v4424_v27  ;;  %3421 = vmatprep.mubr.msk.f32.mxu0 %vm4151_vm0, %v4152_v1 }
0x1678   :  { %3683 = vmatprep.subr.bf16.mxu0 %v4150_v0 }
0x167b   :  { %3685 = vmatpush3.bf16.msra.mxu0 %v4430_v31 }
0x167c   :  { %3698 = vmatprep.subr.bf16.mxu0 %v4150_v0 }
0x167e   :  { %3422 = vmatmul.mubr.msk.f32.vlgmr.msra.gmra.mrb[12].mxu0 %vm123_vm1, %v4380_v41 }
0x167f   :  { %3700 = vmatpush3.bf16.msra.mxu0 %v4406_v17  ;;  %3454 = vmatprep.mubr.msk.f32.mxu0 %vm4151_vm0, %v4152_v1 }
0x1680   :  { %3701 = vmatprep.subr.bf16.mxu0 %v4150_v0 }
0x1683   :  { %3703 = vmatpush3.bf16.msra.mxu0 %v4410_v20 }
0x1684   :  { %3704 = vmatprep.subr.bf16.mxu0 %v4150_v0 }
0x1686   :  { %3455 = vmatmul.mubr.msk.f32.vlgmr.msra.gmra.mrb[14].mxu0 %vm123_vm1, %v4338_v46  ;;  %v4585_v46 = vld [vmem:[%s4767_s4] ss:$0 sm:$0xff]  ;;  %s4154_s4 = smov 96  }
0x1687   :  { %3706 = vmatpush3.bf16.msra.mxu0 %v4424_v27  ;;  %3465 = vmatprep.mubr.msk.f32.mxu0 %vm4151_vm0, %v4152_v1 }
0x1688   :  { %3707 = vmatprep.subr.bf16.mxu0 %v4150_v0 }
0x168b   :  { %3709 = vmatpush3.bf16.msra.mxu0 %v4430_v31 }
0x168c   :  { %3722 = vmatprep.subr.bf16.mxu0 %v4150_v0 }
0x168e   :  { %3466 = vmatmul.mubr.msk.f32.vlgmr.msra.gmra.mrb[14].mxu0 %vm123_vm1, %v4415_v24 }
0x168f   :  { %3724 = vmatpush3.bf16.msra.mxu0 %v4499_v53  ;;  %3498 = vmatprep.mubr.msk.f32.mxu0 %vm4151_vm0, %v4152_v1 }
0x1690   :  { %3725 = vmatprep.subr.bf16.mxu0 %v4150_v0 }
0x1693   :  { %3727 = vmatpush3.bf16.msra.mxu0 %v4510_v56 }
0x1694   :  { %3734 = vmatprep.subr.bf16.mxu0 %v4150_v0 }
0x1696   :  { %3499 = vmatmul.mubr.msk.f32.vlgmr.msra.gmra.mrb[8].mxu0 %vm123_vm1, %v3047_v28 }
0x1697   :  { %3736 = vmatpush3.bf16.msra.mxu0 %v4499_v53  ;;  %3520 = vmatprep.mubr.msk.f32.mxu0 %vm4151_vm0, %v4152_v1 }
0x1698   :  { %3737 = vmatprep.subr.bf16.mxu0 %v4150_v0 }
0x169b   :  { %3739 = vmatpush3.bf16.msra.mxu0 %v4510_v56 }
0x169c   :  { %3746 = vmatprep.subr.bf16.mxu0 %v4150_v0 }
0x1769   :  { %v2159_v2 = vpop.f32.mrb[8].mxu0 }
0x176a   :  { %v3770_v22 = vadd.f32 %v4585_v46, %v2159_v2  ;;  %v3500_v41 = vpop.f32.mrb[9].mxu0 }
0x176c   :  { %3891 = vtanh.f32 %v3770_v22  ;;  %v3050_v58 = vmul.f32 -1.442695, %v3770_v22 }
0x176e   :  { %3893 = vpow2.f32 %v3050_v58 }
0x1776   :  { %v3892_v57 = vpop.eup %3891 }
0x1777   :  { %2177 = vrot.lane.b32.xlu1 %v3892_v57, %s4153_s24 }
0x1778   :  { %v3894_v59 = vpop.eup %3893 }
0x1779   :  { %v2167_v60 = vadd.f32 1.0, %v3894_v59 }
0x177b   :  { %3895 = vrcp.f32 %v2167_v60 }
0x1785   :  { %v3896_v61 = vpop.eup %3895 }
0x1786   :  { %v2175_v4 = vmul.f32 %v3896_v61, %v2173_v3 }
0x17e9   :  { %v2178_v62 = vpop.permute.xlu1 %2177 }
0x17ea   :  { %v2180_v63 = vmul.f32 %v3896_v61, %v2178_v62 }
0x17ec   :  { %2182 = vrot.lane.b32.xlu1 %v2180_v63, %s4146_s3 }
0x185e   :  { %v2183_v6 = vpop.permute.xlu1 %2182 }
0x185f   :  { %v2185_v8 = vadd.f32 %v2183_v6, %v2175_v4 }
0x1861   :  { %3897 = vtanh.f32 %v2185_v8 }
0x186b   :  { %v3898_v9 = vpop.eup %3897 }
0x186c   :  { %2188 = vrot.lane.b32.xlu0 %v3898_v9, %s4153_s24 }
0x18de   :  { %v2189_v10 = vpop.permute.xlu0 %2188 }
0x18df   :  { %v2191_v11 = vmul.f32 %v3896_v61, %v2189_v10 }
0x18e1   :  { %2193 = vrot.lane.b32.xlu1 %v2191_v11, %s4146_s3 }
0x1953   :  { %v4592_v12 = vpop.permute.xlu1 %2193 }
0x1954   :  { %3510 = vmatmul.mubr.msk.f32.vlgmr.msra.gmra.mrb[8].mxu1 %vm123_vm1, %v4592_v12 }
0x1955   :  { %3742 = vmatpush3.bf16.msra.mxu1 %v4499_v53  ;;  %3531 = vmatprep.mubr.msk.f32.mxu1 %vm4151_vm0, %v4152_v1 }
0x1956   :  { %3743 = vmatprep.subr.bf16.mxu1 %v4150_v0 }
0x1959   :  { %3745 = vmatpush3.bf16.msra.mxu1 %v4510_v56 }
0x195a   :  { %3752 = vmatprep.subr.bf16.mxu1 %v4150_v0 }
0x1a27   :  { %v2263_v13 = vpop.f32.mrb[8].mxu1 }
0x1a28   :  { %v3771_v14 = vadd.f32 %v4585_v46, %v2263_v13  ;;  %v3511_v15 = vpop.f32.mrb[9].mxu1 }
0x1a2a   :  { %3899 = vtanh.f32 %v3771_v14  ;;  %v3052_v17 = vmul.f32 -1.442695, %v3771_v14 }
0x1a2c   :  { %3901 = vpow2.f32 %v3052_v17 }
0x1a34   :  { %v3900_v16 = vpop.eup %3899 }
0x1a35   :  { %2277 = vrot.lane.b32.xlu0 %v3900_v16, %s4153_s24 }
0x1a36   :  { %v3902_v18 = vpop.eup %3901 }
0x1a37   :  { %v2271_v19 = vadd.f32 1.0, %v3902_v18 }
0x1a39   :  { %3903 = vrcp.f32 %v2271_v19 }
0x1a43   :  { %v3904_v20 = vpop.eup %3903 }
0x1a44   :  { %v2275_v24 = vmul.f32 %v3904_v20, %v2185_v8 }
0x1aa7   :  { %v2278_v21 = vpop.permute.xlu0 %2277 }
0x1aa8   :  { %v2280_v23 = vmul.f32 %v3904_v20, %v2278_v21 }
0x1aaa   :  { %2282 = vrot.lane.b32.xlu1 %v2280_v23, %s4146_s3 }
0x1b1c   :  { %v2283_v25 = vpop.permute.xlu1 %2282 }
0x1b1d   :  { %v2285_v26 = vadd.f32 %v2283_v25, %v2275_v24 }
0x1b1f   :  { %3905 = vtanh.f32 %v2285_v26 }
0x1b29   :  { %v3906_v27 = vpop.eup %3905 }
0x1b2a   :  { %2288 = vrot.lane.b32.xlu0 %v3906_v27, %s4153_s24 }
0x1b9c   :  { %v2289_v29 = vpop.permute.xlu0 %2288 }
0x1b9d   :  { %v2291_v30 = vmul.f32 %v3904_v20, %v2289_v29 }
0x1b9f   :  { %2293 = vrot.lane.b32.xlu1 %v2291_v30, %s4146_s3 }
0x1c11   :  { %v4607_v31 = vpop.permute.xlu1 %2293 }
0x1c12   :  { %3521 = vmatmul.mubr.msk.f32.vlgmr.msra.gmra.mrb[10].mxu0 %vm123_vm1, %v4607_v31 }
0x1c13   :  { %3748 = vmatpush3.bf16.msra.mxu0 %v4499_v53  ;;  %3542 = vmatprep.mubr.msk.f32.mxu0 %vm4151_vm0, %v4152_v1 }
0x1c14   :  { %3749 = vmatprep.subr.bf16.mxu0 %v4150_v0 }
0x1c17   :  { %3751 = vmatpush3.bf16.msra.mxu0 %v4510_v56 }
0x1c18   :  { %3758 = vmatprep.subr.bf16.mxu0 %v4150_v0 }
0x1ce5   :  { %v2363_v32 = vpop.f32.mrb[10].mxu0 }
0x1ce6   :  { %v3772_v33 = vadd.f32 %v4585_v46, %v2363_v32  ;;  %v3522_v34 = vpop.f32.mrb[11].mxu0 }
0x1ce8   :  { %3907 = vtanh.f32 %v3772_v33  ;;  %v3054_v36 = vmul.f32 -1.442695, %v3772_v33 }
0x1cea   :  { %3909 = vpow2.f32 %v3054_v36 }
0x1cf2   :  { %v3908_v35 = vpop.eup %3907 }
0x1cf3   :  { %2377 = vrot.lane.b32.xlu0 %v3908_v35, %s4153_s24 }
0x1cf4   :  { %v3910_v37 = vpop.eup %3909 }
0x1cf5   :  { %v2371_v38 = vadd.f32 1.0, %v3910_v37 }
0x1cf7   :  { %3911 = vrcp.f32 %v2371_v38 }
0x1d01   :  { %v3912_v39 = vpop.eup %3911 }
0x1d02   :  { %v2375_v43 = vmul.f32 %v3912_v39, %v2285_v26 }
0x1d65   :  { %v2378_v40 = vpop.permute.xlu0 %2377 }
0x1d66   :  { %v2380_v42 = vmul.f32 %v3912_v39, %v2378_v40 }
0x1d68   :  { %2382 = vrot.lane.b32.xlu1 %v2380_v42, %s4146_s3 }
0x1dda   :  { %v2383_v44 = vpop.permute.xlu1 %2382 }
0x1ddb   :  { %v2385_v45 = vadd.f32 %v2383_v44, %v2375_v43 }
0x1ddd   :  { %3913 = vtanh.f32 %v2385_v45 }
0x1de7   :  { %v3914_v48 = vpop.eup %3913 }
0x1de8   :  { %2388 = vrot.lane.b32.xlu0 %v3914_v48, %s4153_s24 }
0x1e5a   :  { %v2389_v5 = vpop.permute.xlu0 %2388 }
0x1e5b   :  { %v2391_v49 = vmul.f32 %v3912_v39, %v2389_v5 }
0x1e5d   :  { %2393 = vrot.lane.b32.xlu1 %v2391_v49, %s4146_s3 }
0x1ecf   :  { %v4622_v50 = vpop.permute.xlu1 %2393 }
0x1ed0   :  { %3532 = vmatmul.mubr.msk.f32.vlgmr.msra.gmra.mrb[10].mxu1 %vm123_vm1, %v4622_v50 }
0x1ed1   :  { %3754 = vmatpush3.bf16.msra.mxu1 %v4499_v53  ;;  %3553 = vmatprep.mubr.msk.f32.mxu1 %vm4151_vm0, %v4152_v1 }
0x1ed2   :  { %3755 = vmatprep.subr.bf16.mxu1 %v4150_v0 }
0x1ed5   :  { %3757 = vmatpush3.bf16.msra.mxu1 %v4510_v56 }
0x1ed6   :  { %3764 = vmatprep.subr.bf16.mxu1 %v4150_v0 }
0x1fa3   :  { %v2463_v51 = vpop.f32.mrb[10].mxu1 }
0x1fa4   :  { %v3773_v52 = vadd.f32 %v4585_v46, %v2463_v51  ;;  %v3533_v7 = vpop.f32.mrb[11].mxu1 }
0x1fa6   :  { %3915 = vtanh.f32 %v3773_v52  ;;  %v3056_v55 = vmul.f32 -1.442695, %v3773_v52 }
0x1fa8   :  { %3917 = vpow2.f32 %v3056_v55 }
0x1fb0   :  { %v3916_v54 = vpop.eup %3915 }
0x1fb1   :  { %2477 = vrot.lane.b32.xlu0 %v3916_v54, %s4153_s24 }
0x1fb2   :  { %v3918_v28 = vpop.eup %3917 }
0x1fb3   :  { %v2471_v2 = vadd.f32 1.0, %v3918_v28 }
0x1fb5   :  { %3919 = vrcp.f32 %v2471_v2 }
0x1fbf   :  { %v3920_v22 = vpop.eup %3919 }
0x1fc0   :  { %v2475_v58 = vmul.f32 %v3920_v22, %v2385_v45 }
0x2023   :  { %v2478_v41 = vpop.permute.xlu0 %2477 }
0x2024   :  { %v2480_v57 = vmul.f32 %v3920_v22, %v2478_v41 }
0x2026   :  { %2482 = vrot.lane.b32.xlu1 %v2480_v57, %s4146_s3 }
0x2098   :  { %v2483_v59 = vpop.permute.xlu1 %2482 }
0x2099   :  { %v2485_v60 = vadd.f32 %v2483_v59, %v2475_v58 }
0x209b   :  { %3921 = vtanh.f32 %v2485_v60 }
0x20a5   :  { %v3922_v61 = vpop.eup %3921 }
0x20a6   :  { %2488 = vrot.lane.b32.xlu0 %v3922_v61, %s4153_s24 }
0x2118   :  { %v2489_v62 = vpop.permute.xlu0 %2488 }
0x2119   :  { %v2491_v63 = vmul.f32 %v3920_v22, %v2489_v62 }
0x211b   :  { %2493 = vrot.lane.b32.xlu1 %v2491_v63, %s4146_s3 }
0x218d   :  { %v4637_v3 = vpop.permute.xlu1 %2493 }
0x218e   :  { %3543 = vmatmul.mubr.msk.f32.vlgmr.msra.gmra.mrb[12].mxu0 %vm123_vm1, %v4637_v3 }
0x218f   :  { %3760 = vmatpush3.bf16.msra.mxu0 %v4499_v53  ;;  %3564 = vmatprep.mubr.msk.f32.mxu0 %vm4151_vm0, %v4152_v1 }
0x2190   :  { %3761 = vmatprep.subr.bf16.mxu0 %v4150_v0 }
0x2193   :  { %3763 = vmatpush3.bf16.msra.mxu0 %v4510_v56 }
0x2261   :  { %v2563_v4 = vpop.f32.mrb[12].mxu0 }
0x2262   :  { %v3774_v6 = vadd.f32 %v4585_v46, %v2563_v4  ;;  %v3544_v8 = vpop.f32.mrb[13].mxu0 }
0x2264   :  { %3923 = vtanh.f32 %v3774_v6  ;;  %v3058_v10 = vmul.f32 -1.442695, %v3774_v6 }
0x2266   :  { %3925 = vpow2.f32 %v3058_v10 }
0x226e   :  { %v3924_v9 = vpop.eup %3923 }
0x226f   :  { %2577 = vrot.lane.b32.xlu0 %v3924_v9, %s4153_s24 }
0x2270   :  { %v3926_v11 = vpop.eup %3925 }
0x2271   :  { %v2571_v13 = vadd.f32 1.0, %v3926_v11 }
0x2273   :  { %3927 = vrcp.f32 %v2571_v13 }
0x227d   :  { %v3928_v14 = vpop.eup %3927 }
0x227e   :  { %v2575_v17 = vmul.f32 %v3928_v14, %v2485_v60 }
0x22e1   :  { %v2578_v15 = vpop.permute.xlu0 %2577 }
0x22e2   :  { %v2580_v16 = vmul.f32 %v3928_v14, %v2578_v15 }
0x22e4   :  { %2582 = vrot.lane.b32.xlu1 %v2580_v16, %s4146_s3 }
0x2356   :  { %v2583_v18 = vpop.permute.xlu1 %2582 }
0x2357   :  { %v2585_v19 = vadd.f32 %v2583_v18, %v2575_v17 }
0x2359   :  { %3929 = vtanh.f32 %v2585_v19 }
0x2363   :  { %v3930_v20 = vpop.eup %3929 }
0x2364   :  { %2588 = vrot.lane.b32.xlu0 %v3930_v20, %s4153_s24 }
0x23d6   :  { %v2589_v21 = vpop.permute.xlu0 %2588 }
0x23d7   :  { %v2591_v23 = vmul.f32 %v3928_v14, %v2589_v21 }
0x23d9   :  { %2593 = vrot.lane.b32.xlu1 %v2591_v23, %s4146_s3 }
0x244b   :  { %v4651_v24 = vpop.permute.xlu1 %2593 }
0x244c   :  { %3554 = vmatmul.mubr.msk.f32.vlgmr.msra.gmra.mrb[12].mxu1 %vm123_vm1, %v4651_v24 }
0x244d   :  { %3766 = vmatpush3.bf16.msra.mxu1 %v4499_v53  ;;  %3575 = vmatprep.mubr.msk.f32.mxu1 %vm4151_vm0, %v4152_v1 }
0x244e   :  { %3767 = vmatprep.subr.bf16.mxu1 %v4150_v0 }
0x2451   :  { %3769 = vmatpush3.bf16.msra.mxu1 %v4510_v56 }
0x251f   :  { %v2663_v25 = vpop.f32.mrb[12].mxu1 }
0x2520   :  { %v3775_v26 = vadd.f32 %v4585_v46, %v2663_v25  ;;  %v3555_v27 = vpop.f32.mrb[13].mxu1 }
0x2522   :  { %3931 = vtanh.f32 %v3775_v26  ;;  %v3060_v30 = vmul.f32 -1.442695, %v3775_v26 }
0x2524   :  { %3933 = vpow2.f32 %v3060_v30 }
0x252c   :  { %v3932_v29 = vpop.eup %3931 }
0x252d   :  { %2677 = vrot.lane.b32.xlu0 %v3932_v29, %s4153_s24 }
0x252e   :  { %v3934_v32 = vpop.eup %3933 }
0x252f   :  { %v2671_v33 = vadd.f32 1.0, %v3934_v32 }
0x2531   :  { %3935 = vrcp.f32 %v2671_v33 }
0x253b   :  { %v3936_v53 = vpop.eup %3935 }
0x253c   :  { %v2675_v0 = vmul.f32 %v3936_v53, %v2585_v19 }
0x259f   :  { %v2678_v34 = vpop.permute.xlu0 %2677 }
0x25a0   :  { %v2680_v1 = vmul.f32 %v3936_v53, %v2678_v34 }
0x25a2   :  { %2682 = vrot.lane.b32.xlu1 %v2680_v1, %s4146_s3 }
0x2614   :  { %v2683_v56 = vpop.permute.xlu1 %2682 }
0x2615   :  { %v2685_v35 = vadd.f32 %v2683_v56, %v2675_v0 }
0x2617   :  { %3937 = vtanh.f32 %v2685_v35 }
0x2621   :  { %v3938_v36 = vpop.eup %3937 }
0x2622   :  { %2688 = vrot.lane.b32.xlu0 %v3938_v36, %s4153_s24 }
0x2694   :  { %v2689_v37 = vpop.permute.xlu0 %2688 }
0x2695   :  { %v2691_v38 = vmul.f32 %v3936_v53, %v2689_v37 }
0x2697   :  { %2693 = vrot.lane.b32.xlu1 %v2691_v38, %s4146_s3 }
0x2709   :  { %v4665_v39 = vpop.permute.xlu1 %2693 }
0x270a   :  { %3565 = vmatmul.mubr.msk.f32.vlgmr.msra.gmra.mrb[14].mxu0 %vm123_vm1, %v4665_v39 }
0x27dd   :  { %v2763_v40 = vpop.f32.mrb[14].mxu0 }
0x27de   :  { %v3776_v42 = vadd.f32 %v4585_v46, %v2763_v40  ;;  %v3566_v43 = vpop.f32.mrb[15].mxu0 }
0x27e0   :  { %3939 = vtanh.f32 %v3776_v42  ;;  %v3062_v45 = vmul.f32 -1.442695, %v3776_v42 }
0x27e2   :  { %3941 = vpow2.f32 %v3062_v45 }
0x27ea   :  { %v3940_v44 = vpop.eup %3939 }
0x27eb   :  { %2777 = vrot.lane.b32.xlu0 %v3940_v44, %s4153_s24 }
0x27ec   :  { %v3942_v48 = vpop.eup %3941 }
0x27ed   :  { %v2771_v5 = vadd.f32 1.0, %v3942_v48 }
0x27ef   :  { %3943 = vrcp.f32 %v2771_v5 }
0x27f9   :  { %v3944_v49 = vpop.eup %3943 }
0x27fa   :  { %v2775_v7 = vmul.f32 %v3944_v49, %v2685_v35 }
0x285d   :  { %v2778_v51 = vpop.permute.xlu0 %2777 }
0x285e   :  { %v2780_v52 = vmul.f32 %v3944_v49, %v2778_v51 }
0x2860   :  { %2782 = vrot.lane.b32.xlu1 %v2780_v52, %s4146_s3 }
0x28d2   :  { %v2783_v54 = vpop.permute.xlu1 %2782 }
0x28d3   :  { %v2785_v55 = vadd.f32 %v2783_v54, %v2775_v7 }
0x28d5   :  { %3945 = vtanh.f32 %v2785_v55 }
0x28df   :  { %v3946_v28 = vpop.eup %3945 }
0x28e0   :  { %2788 = vrot.lane.b32.xlu0 %v3946_v28, %s4153_s24 }
0x2952   :  { %v2789_v2 = vpop.permute.xlu0 %2788 }
0x2953   :  { %v2791_v22 = vmul.f32 %v3944_v49, %v2789_v2 }
0x2955   :  { %2793 = vrot.lane.b32.xlu1 %v2791_v22, %s4146_s3 }
0x29c7   :  { %v2794_v41 = vpop.permute.xlu1 %2793 }
0x29c8   :  { %3576 = vmatmul.mubr.msk.f32.vlgmr.msra.gmra.mrb[14].mxu1 %vm123_vm1, %v2794_v41 }
0x2a9b   :  { %v2863_v57 = vpop.f32.mrb[14].mxu1 }
0x2a9c   :  { %v3777_v58 = vadd.f32 %v4585_v46, %v2863_v57  ;;  %v3577_v59 = vpop.f32.mrb[15].mxu1  ;;  %v2904_v46 = vlaneseq }
0x2a9e   :  { %3947 = vtanh.f32 %v3777_v58  ;;  %v3064_v61 = vmul.f32 -1.442695, %v3777_v58  ;;  %v2905_v13 = vand.u32 127, %v2904_v46 }
0x2aa0   :  { %3949 = vpow2.f32 %v3064_v61  ;;  %vm2906_vm3 = vcmp.lt.s32.totalorder %v2905_v13, 16 }
0x2aa1   :  { %v2911_v15 = vsel %vm2906_vm3, %v4607_v31, %v2794_v41  ;;  %v2914_v16 = vsel %vm2906_vm3, %v4622_v50, %v4665_v39  ;;  %v2917_v17 = vsel %vm2906_vm3, %v4637_v3, %v4651_v24  ;;  %v2919_v21 = vsel %vm2906_vm3, %v4665_v39, %v4622_v50 }
0x2aa2   :  { %v2920_v25 = vsel %vm2906_vm3, %v2794_v41, %v4607_v31 }
0x2aa8   :  { %v3948_v60 = vpop.eup %3947 }
0x2aa9   :  { %2877 = vrot.lane.b32.xlu0 %v3948_v60, %s4153_s24 }
0x2aaa   :  { %v3950_v62 = vpop.eup %3949 }
0x2aab   :  { %v2871_v63 = vadd.f32 1.0, %v3950_v62 }
0x2aad   :  { %3951 = vrcp.f32 %v2871_v63 }
0x2ab7   :  { %v3952_v4 = vpop.eup %3951 }
0x2ab8   :  { %v2875_v9 = vmul.f32 %v3952_v4, %v2785_v55 }
0x2b1b   :  { %v2878_v6 = vpop.permute.xlu0 %2877 }
0x2b1c   :  { %v2880_v8 = vmul.f32 %v3952_v4, %v2878_v6 }
0x2b1e   :  { %2882 = vrot.lane.b32.xlu1 %v2880_v8, %s4146_s3 }
0x2b90   :  { %v2883_v10 = vpop.permute.xlu1 %2882 }
0x2b91   :  { %v2885_v11 = vadd.f32 %v2883_v10, %v2875_v9 }
0x2b93   :  { %3953 = vtanh.f32 %v2885_v11 }
0x2b9d   :  { %v3954_v14 = vpop.eup %3953 }
0x2b9e   :  { %2888 = vrot.lane.b32.xlu0 %v3954_v14, %s4153_s24 }
0x2ba2   :  { %2923 = vrot.lane.b32.xlu0 %v2911_v15, %s4146_s3 }
0x2ba6   :  { %2927 = vrot.lane.b32.xlu0 %v2914_v16, %s4153_s24 }
0x2baa   :  { %2931 = vrot.lane.b32.xlu0 %v2917_v17, %s4154_s4 }
0x2bae   :  { %933 = vrot.lane.b32.xlu0 %v4488_v47, %s4154_s4 }
0x2c10   :  { %v2889_v18 = vpop.permute.xlu0 %2888 }
0x2c11   :  { %v2891_v19 = vmul.f32 %v3952_v4, %v2889_v18 }
0x2c13   :  { %2893 = vrot.lane.b32.xlu1 %v2891_v19, %s4146_s3 }
0x2c14   :  { %v2924_v20 = vpop.permute.xlu0 %2923 }
0x2c17   :  { %2935 = vrot.lane.b32.xlu1 %v2919_v21, %s4146_s3 }
0x2c18   :  { %v2928_v23 = vpop.permute.xlu0 %2927 }
0x2c1b   :  { %2939 = vrot.lane.b32.xlu1 %v2920_v25, %s4153_s24 }
0x2c1c   :  { %v2932_v26 = vpop.permute.xlu0 %2931 }
0x2c20   :  { %v934_v27 = vpop.permute.xlu0 %933 }
0x2c21   :  { %936 = vst.msk [vmem:[#allocation14] sm:$0x3] %vm930_vm2, %v934_v27 }
0x2c85   :  { %v2894_v47 = vpop.permute.xlu1 %2893 }
0x2c86   :  { %2897 = vst.msk [vmem:[#allocation12 + $0x2] sm:$0x3] %vm930_vm2, %v2894_v47  ;;  %v2921_v50 = vsel %vm2906_vm3, %v2894_v47, %v4592_v12 }
0x2c87   :  { %2943 = vrot.lane.b32.xlu1 %v2921_v50, %s4154_s4 }
0x2c88   :  { %4076 = shalt.err (!%p4073_p2)
}
0x2c89   :  { %s4077_s29 = scalar_lea.hbm %s4772_s9, 64 }
0x2c8a   :  { %p4078_p3 = scmp.ne.s32.totalorder %s4772_s9, %s4077_s29  ;;  %p4081_p4 = scmp.lt.u32.totalorder %s4077_s29, %s4772_s9 }
0x2c8c   :  { %p4083_p5 = pnand %p4081_p4, %p4078_p3 }
0x2c8e   :  { %4086 = shalt.err (!%p4083_p5)
}
0x2c8f   :  { %2987 = dma.vmem_to_hbm [thread:$0]  %s2982_s0, 64, %s4772_s9, [#allocation13], %s4146_s3, %s4146_s3, %s4147_s28   ;;  %v2936_v31 = vpop.permute.xlu1 %2935  ;;  %v2908_v29 = vsel %vm2906_vm3, %v4592_v12, %v2894_v47  ;;  %vm2947_vm4 = vcmask 523264   ;;  %v2918_v33 = vsel %vm2906_vm3, %v4651_v24, %v4637_v3  ;;  %vm2949_vm5 = vcmask 785408  }
0x2c90   :  { %2899 = vrot.lane.b32.xlu1 %v2885_v11, %s4154_s4  ;;  %v2946_v30 = vsel %vm123_vm1, %v2908_v29, %v2924_v20  ;;  %v2951_v34 = vsel %vm123_vm1, %v2918_v33, %v2936_v31  ;;  %s4156_s2 = smov [#allocation11]   ;;  %s4157_s16 = smov [#allocation14]  }
0x2c91   :  { %v2948_v53 = vsel %vm2947_vm4, %v2946_v30, %v2928_v23  ;;  %s2972_s9 = sshll.u32 %s4156_s2, 4  ;;  %s2993_s5 = sshll.u32 %s4157_s16, 4  ;;  %s2973_s9 = int_to_ptr.vmem [resolvable:$true] %s2972_s9  ;;  %s4728_s5 = int_to_ptr.vmem [resolvable:$true] %s2993_s5 }
0x2c92   :  { %v2950_v56 = vsel %vm2949_vm5, %v2948_v53, %v2932_v26  ;;  %s4087_s23 = scalar_lea.vmem %s2973_s9, 64  ;;  %p4092_p7 = scmp.lt.s32.totalorder %s2973_s9, %s2973_s9 }
0x2c93   :  { %v2940_v32 = vpop.permute.xlu1 %2939  ;;  %p4088_p6 = scmp.ne.s32.totalorder %s2973_s9, %s4087_s23  ;;  %p4093_p8 = scmp.lt.s32.totalorder %s4087_s23, %s4087_s23 }
0x2c94   :  { %v2952_v1 = vsel %vm2947_vm4, %v2951_v34, %v2940_v32 }
0x2c95   :  { %p4094_p9 = por %p4093_p8, %p4092_p7 }
0x2c97   :  { %p4095_p10 = pnand %p4094_p9, %p4088_p6 }
0x2cf9   :  { %v2944_v0 = vpop.permute.xlu1 %2943 }
0x2cfa   :  { %v2953_v12 = vsel %vm2949_vm5, %v2952_v1, %v2944_v0 }
0x2cfb   :  { %v2956_v35 = vcombine.low %v2950_v56, %v2953_v12 }
0x2cfd   :  { %3065 = vst.sshfl [vmem:[#allocation11] sm:$0x33 pattern:$0x76325410] %v2956_v35 }
0x2d02   :  { %v2900_v36 = vpop.permute.xlu1 %2899 }
0x2d03   :  { %2903 = vst.msk [vmem:[#allocation14 + $0x2] sm:$0x3] %vm930_vm2, %v2900_v36 }
0x2d04   :  { %4098 = shalt.err (!%p4095_p10)
}
0x2d05   :  { %s4099_s14 = scalar_lea.hbm %s4771_s8, 64 }
0x2d06   :  { %p4100_p11 = scmp.ne.s32.totalorder %s4771_s8, %s4099_s14  ;;  %p4103_p12 = scmp.lt.u32.totalorder %s4099_s14, %s4771_s8 }
0x2d08   :  { %p4105_p13 = pnand %p4103_p12, %p4100_p11 }
0x2d0a   :  { %4108 = shalt.err (!%p4105_p13)
}
0x2d0b   :  { %2975 = dma.vmem_to_hbm [thread:$0]  %s2973_s9, 64, %s4771_s8, [#allocation4]  }
0x2d0c   :  { %s4109_s4 = scalar_lea.vmem %s4728_s5, 64  ;;  %p4114_p1 = scmp.lt.s32.totalorder %s4728_s5, %s4728_s5 }
0x2d0d   :  { %p4110_p0 = scmp.ne.s32.totalorder %s4728_s5, %s4109_s4  ;;  %p4115_p2 = scmp.lt.s32.totalorder %s4109_s4, %s4109_s4 }
0x2d0f   :  { %p4116_p3 = por %p4115_p2, %p4114_p1 }
0x2d11   :  { %p4117_p4 = pnand %p4116_p3, %p4110_p0 }
0x2d13   :  { %4120 = shalt.err (!%p4117_p4)
}
0x2d14   :  { %s4121_s30 = scalar_lea.hbm %s4773_s10, 64 }
0x2d15   :  { %p4122_p5 = scmp.ne.s32.totalorder %s4773_s10, %s4121_s30  ;;  %p4125_p6 = scmp.lt.u32.totalorder %s4121_s30, %s4773_s10 }
0x2d17   :  { %p4127_p7 = pnand %p4125_p6, %p4122_p5 }
0x2d19   :  { %4130 = shalt.err (!%p4127_p7)
}
0x2d1a   :  { %2999 = dma.vmem_to_hbm [thread:$0]  %s4728_s5, 64, %s4773_s10, [#allocation13], %s4146_s3, %s4146_s3, %s4147_s28  }
0x2d1b   :  { %4137 = dma.done.wait [#allocation4], 64  }
0x2d1c   :  { %4138 = vsyncadd [#allocation4], 4294967232 }
0x2d1d   :  { %4139 = dma.done.wait [#allocation13], 128  }
0x2d1e   :  { %4140 = vsyncadd [#allocation13], 4294967168 }
0x2d1f   :  { %3009 = vsyncpa [#allocation3], 1 }
0x2d20   :  { %3010 = vsyncpa [#allocation6], 1 }
0x2d21   :  { %3011 = vsyncpa [#allocation9], 1 }
0x2d22   :  { %3012 = vsyncpa [#allocation4], 1 }
0x2d23   :  { %3013 = vsyncpa [#allocation13], 1 }

</bundles_post_ra>
